<compile_context>
chip_gen: v5e
topology: v5e:2x2
jax: 0.10.0
libtpu: 0.0.40
codegen_flags: <defaults>
</compile_context>

<pallas_src>
import functools

import jax
import jax.numpy as jnp
from jax.experimental import pallas as pl
from jax.experimental.pallas import tpu as pltpu


def prenorm_kernel(x_ref, w_ref, fb_ref, o_ref, *, eps, inv_c):
    # x_ref: (C, T) -- channels on sublanes, spatial pixels on lanes.
    x = x_ref[...].astype(jnp.float32)

    # Single-pass moments over the channel (sublane) axis.
    s1 = jnp.sum(x, axis=0, keepdims=True)             # (1, T)
    s2 = jnp.sum(x * x, axis=0, keepdims=True)         # (1, T)
    mean = s1 * inv_c
    var = jnp.maximum(s2 * inv_c - mean * mean, 0.0)
    std = jnp.sqrt(var)
    # PyTorch module semantics: (x - mean) / (sqrt(var) + eps).
    # Row-only (1, T) reciprocal on the EUP (approx) -- essentially free.
    inv = pl.reciprocal(std + eps, approx=True)

    normed = (x - mean) * inv                           # (C, T), sublane broadcast
    # gamma/beta are pre-folded into w_ref / fb_ref in the wrapper.

    # fn: 1x1 conv == per-pixel channel matmul on the MXU, bf16 feed, f32 acc.
    y = jnp.dot(w_ref[...], normed.astype(w_ref.dtype),
                preferred_element_type=jnp.float32)
    y = y + fb_ref[...]                                 # (C_out, 1) lane broadcast
    o_ref[...] = y.astype(o_ref.dtype)


def _pick_spatial_tile(hw, n_batch, c_in, c_out, x_bytes, vmem_budget_bytes):
    """Largest multiple-of-128 divisor of hw whose (C, T)/(C_out, T) tiles fit
    the VMEM budget.  Falls back to the full spatial extent (block == full dim
    is always legal).  Keeps >= 2 total grid steps when batch == 1 so the
    second TensorCore on v7x has work."""
    # Per-lane VMEM cost estimate: double-buffered x / out tiles plus the f32
    # intermediates (x, normed, y) and the bf16 MXU feed copy.
    per_lane = (2 * (c_in + c_out) * x_bytes          # double-buffered I/O
                + 4 * (2 * c_in + c_out)              # f32 intermediates
                + 2 * c_in)                           # bf16 MXU feed
    cap = max(128, (vmem_budget_bytes // per_lane) // 128 * 128)
    if n_batch < 2:
        # Force >= 2 grid steps (megacore on v7x) whenever hw allows it.
        cap = min(cap, max(128, (hw // 2) // 128 * 128))
    best = None
    t = 128
    limit = min(hw, cap)
    while t <= limit:
        if hw % t == 0:
            best = t
        t += 128
    return best if best is not None else hw


def prenorm_fn(x_nchw, g, b, w, fb, *, eps=1e-5,
               mxu_dtype=jnp.bfloat16,
               vmem_budget_bytes=40 * 1024 * 1024):
    """PreNorm forward.

    x_nchw: (N, C, H, W)
    g, b  : (1, C, 1, 1)   LayerNorm affine params
    w     : (C_out, C_in)  1x1-conv weight of `fn`
    fb    : (C_out,)       1x1-conv bias of `fn`
    Returns (N, C_out, H, W).
    """
    N, C, H, W = x_nchw.shape
    C_out, C_in = w.shape
    assert C_in == C, "fn weight must have C_in == channel dim"
    HW = H * W
    x_bytes = jnp.dtype(x_nchw.dtype).itemsize
    T = _pick_spatial_tile(HW, N, C, C_out, x_bytes, vmem_budget_bytes)
    assert HW % T == 0

    # Metadata-only reshape; no HBM transpose anywhere.
    x3 = x_nchw.reshape(N, C, HW)

    # Fold gamma/beta into the linear fn:  w @ (n*g + b) == (w*g) @ n + w@b.
    g_vec = g.reshape(C).astype(jnp.float32)
    b_vec = b.reshape(C).astype(jnp.float32)
    w_f32 = w.astype(jnp.float32)
    w_eff = (w_f32 * g_vec[None, :]).astype(mxu_dtype)              # (C_out, C_in) bf16
    fb_eff = (fb.astype(jnp.float32)
              + jnp.dot(w_f32, b_vec)).reshape(C_out, 1)            # (C_out, 1) f32

    out3 = pl.pallas_call(
        functools.partial(prenorm_kernel, eps=eps, inv_c=1.0 / C),
        out_shape=jax.ShapeDtypeStruct((N, C_out, HW), x_nchw.dtype),
        grid_spec=pltpu.PrefetchScalarGridSpec(
            num_scalar_prefetch=0,
            grid=(N, HW // T),
            in_specs=[
                pl.BlockSpec((None, C, T), lambda n, s: (n, 0, s)),   # x
                pl.BlockSpec((C_out, C_in), lambda n, s: (0, 0)),     # folded weight
                pl.BlockSpec((C_out, 1), lambda n, s: (0, 0)),        # folded bias
            ],
            out_specs=pl.BlockSpec((None, C_out, T), lambda n, s: (n, 0, s)),
        ),
        compiler_params=pltpu.CompilerParams(
            dimension_semantics=("parallel", "parallel"),
            # 48 MiB: above the tile budget, still <= v7x's 64 MiB physical VMEM
            # and far below v5e/v6e's 128 MiB.
            vmem_limit_bytes=48 * 1024 * 1024,
        ),
    )(x3, w_eff, fb_eff)

    return out3.reshape(N, C_out, H, W)


def prenorm_reference(x_nchw, g, b, w, fb, eps=1e-5):
    mean = jnp.mean(x_nchw, axis=1, keepdims=True)
    var = jnp.mean((x_nchw - mean) ** 2, axis=1, keepdims=True)
    std = jnp.sqrt(var)
    normed = (x_nchw - mean) / (std + eps) * g + b
    # 1x1 conv with weight (C_out, C_in)
    y = jnp.einsum("nchw,dc->ndhw", normed, w,
                   precision=jax.lax.Precision.HIGHEST)
    return y + fb.reshape(1, -1, 1, 1)


if __name__ == "__main__":
    key = jax.random.PRNGKey(0)
    N, C, H, W = 2, 64, 32, 32     # 1024 pixels -> single full-extent lane tile per batch

    kx, kw, kg, kb, kfb = jax.random.split(key, 5)
    x = jax.random.normal(kx, (N, C, H, W), dtype=jnp.float32)

    # LayerNorm params (module init is ones/zeros; perturbed to exercise the folding)
    g = 1.0 + 0.1 * jax.random.normal(kg, (1, C, 1, 1), dtype=jnp.float32)
    b = 0.1 * jax.random.normal(kb, (1, C, 1, 1), dtype=jnp.float32)
    # Deterministic fn (1x1 conv) params, PyTorch (C_out, C_in) layout
    w = jax.random.normal(kw, (C, C), dtype=jnp.float32) * 0.02
    fb = 0.1 * jax.random.normal(kfb, (C,), dtype=jnp.float32)

    out = jax.block_until_ready(prenorm_fn(x, g, b, w, fb))
    ref = prenorm_reference(x, g, b, w, fb)

    assert out.shape == (N, C, H, W)
    # bf16 MXU feed + approx reciprocal -> loosened (but still tight) tolerance.
    assert jnp.allclose(out, ref, atol=2e-2, rtol=2e-2), "mismatch vs reference"
    print("KERNEL_OK")
</pallas_src>

<mosaic_0001>
module attributes {stable_mosaic.version = 11 : i64} {
  func.func @prenorm_kernel(%arg0: i32, %arg1: i32, %arg2: memref<1x64x1024xf32, #tpu.memory_space<vmem>>, %arg3: memref<64x64xbf16, #tpu.memory_space<vmem>>, %arg4: memref<64x1xf32, #tpu.memory_space<vmem>>, %arg5: memref<1x64x1024xf32, #tpu.memory_space<vmem>>) attributes {dimension_semantics = [#tpu.dimension_semantics<parallel>, #tpu.dimension_semantics<parallel>], iteration_bounds = array<i64: 2, 1>, scalar_prefetch = 0 : i64, scratch_operands = 0 : i64, tpu.core_type = #tpu.core_type<tc>, window_params = [{transform_indices = @transform_0, window_bounds = array<i64: 1, 64, 1024>}, {pipeline_mode = #tpu.pipeline_mode<synchronous>, transform_indices = @transform_1, window_bounds = array<i64: 64, 64>}, {pipeline_mode = #tpu.pipeline_mode<synchronous>, transform_indices = @transform_2, window_bounds = array<i64: 64, 1>}, {transform_indices = @transform_3, window_bounds = array<i64: 1, 64, 1024>}]} {
    %c0 = arith.constant 0 : index
    %c0_0 = arith.constant 0 : index
    %c0_1 = arith.constant 0 : index
    %0 = vector.load %arg2[%c0, %c0_0, %c0_1] : memref<1x64x1024xf32, #tpu.memory_space<vmem>>, vector<1x64x1024xf32>
    %1 = vector.shape_cast %0 : vector<1x64x1024xf32> to vector<64x1024xf32>
    %cst = arith.constant dense<0.000000e+00> : vector<1024xf32>
    %2 = vector.multi_reduction <add>, %1, %cst [0] : vector<64x1024xf32> to vector<1024xf32>
    %3 = vector.shape_cast %2 : vector<1024xf32> to vector<1x1024xf32>
    %4 = arith.mulf %1, %1 : vector<64x1024xf32>
    %cst_2 = arith.constant dense<0.000000e+00> : vector<1024xf32>
    %5 = vector.multi_reduction <add>, %4, %cst_2 [0] : vector<64x1024xf32> to vector<1024xf32>
    %6 = vector.shape_cast %5 : vector<1024xf32> to vector<1x1024xf32>
    %cst_3 = arith.constant 1.562500e-02 : f32
    %7 = vector.broadcast %cst_3 : f32 to vector<1x1024xf32>
    %8 = arith.mulf %3, %7 : vector<1x1024xf32>
    %cst_4 = arith.constant 1.562500e-02 : f32
    %9 = vector.broadcast %cst_4 : f32 to vector<1x1024xf32>
    %10 = arith.mulf %6, %9 : vector<1x1024xf32>
    %11 = arith.mulf %8, %8 : vector<1x1024xf32>
    %12 = arith.subf %10, %11 : vector<1x1024xf32>
    %cst_5 = arith.constant 0.000000e+00 : f32
    %13 = vector.broadcast %cst_5 : f32 to vector<1x1024xf32>
    %14 = arith.maximumf %12, %13 : vector<1x1024xf32>
    %15 = math.sqrt %14 : vector<1x1024xf32>
    %cst_6 = arith.constant 9.99999974E-6 : f32
    %16 = vector.broadcast %cst_6 : f32 to vector<1x1024xf32>
    %17 = arith.addf %15, %16 : vector<1x1024xf32>
    %18 = tpu.reciprocal %17 {approx = true} : vector<1x1024xf32> -> vector<1x1024xf32>
    %19 = vector.broadcast %8 : vector<1x1024xf32> to vector<64x1024xf32>
    %20 = arith.subf %1, %19 : vector<64x1024xf32>
    %21 = vector.broadcast %18 : vector<1x1024xf32> to vector<64x1024xf32>
    %22 = arith.mulf %20, %21 : vector<64x1024xf32>
    %c0_7 = arith.constant 0 : index
    %c0_8 = arith.constant 0 : index
    %23 = vector.load %arg3[%c0_7, %c0_8] : memref<64x64xbf16, #tpu.memory_space<vmem>>, vector<64x64xbf16>
    %24 = arith.truncf %22 : vector<64x1024xf32> to vector<64x1024xbf16>
    %cst_9 = arith.constant dense<0.000000e+00> : vector<64x1024xf32>
    %25 = tpu.matmul %23, %24, %cst_9 {dimension_numbers = #tpu.dot_dimension_numbers<[1], [0], [0], [1], [0, 0, 1, 1], [], []>} : vector<64x64xbf16>, vector<64x1024xbf16>, vector<64x1024xf32> -> vector<64x1024xf32>
    %c0_10 = arith.constant 0 : index
    %c0_11 = arith.constant 0 : index
    %26 = vector.load %arg4[%c0_10, %c0_11] : memref<64x1xf32, #tpu.memory_space<vmem>>, vector<64x1xf32>
    %27 = vector.broadcast %26 : vector<64x1xf32> to vector<64x1024xf32>
    %28 = arith.addf %25, %27 : vector<64x1024xf32>
    %c0_12 = arith.constant 0 : index
    %c0_13 = arith.constant 0 : index
    %c0_14 = arith.constant 0 : index
    %29 = vector.load %arg5[%c0_12, %c0_13, %c0_14] : memref<1x64x1024xf32, #tpu.memory_space<vmem>>, vector<1x64x1024xf32>
    %30 = vector.shape_cast %29 : vector<1x64x1024xf32> to vector<64x1024xf32>
    %31 = vector.shape_cast %28 : vector<64x1024xf32> to vector<1x64x1024xf32>
    tpu.vector_store %arg5[%c0_12, %c0_13, %c0_14], %31 {strides = array<i32>} : memref<1x64x1024xf32, #tpu.memory_space<vmem>>, vector<1x64x1024xf32>,
    return
  }
  func.func @transform_0(%arg0: i32, %arg1: i32) -> (i32, i32, i32) {
    %c0_i32 = arith.constant 0 : i32
    %c0_i32_0 = arith.constant 0 : i32
    return %arg0, %c0_i32, %arg1 : i32, i32, i32
  }
  func.func @transform_1(%arg0: i32, %arg1: i32) -> (i32, i32) {
    %c0_i32 = arith.constant 0 : i32
    %c0_i32_0 = arith.constant 0 : i32
    %c0_i32_1 = arith.constant 0 : i32
    return %c0_i32, %c0_i32_0 : i32, i32
  }
  func.func @transform_2(%arg0: i32, %arg1: i32) -> (i32, i32) {
    %c0_i32 = arith.constant 0 : i32
    %c0_i32_0 = arith.constant 0 : i32
    %c0_i32_1 = arith.constant 0 : i32
    return %c0_i32, %c0_i32_0 : i32, i32
  }
  func.func @transform_3(%arg0: i32, %arg1: i32) -> (i32, i32, i32) {
    %c0_i32 = arith.constant 0 : i32
    %c0_i32_0 = arith.constant 0 : i32
    return %arg0, %c0_i32, %arg1 : i32, i32, i32
  }
}

</mosaic_0001>

<bundles_post_ra>
// kernel: tpu_custom_call.1
= control target key start
LH: loop header
LB: loop body
LE: loop exit
PB: predicated region body
PF: predicated region fallthrough
CT: control target
= control target key end

     0   :  { %8 = vsyncpa [#allocation3], 0  ;;  %s2702_s0 = inlined_call_operand.hbm [shape: f32[2,64,1024], index: 0, kind: input, shape index: {}]   ;;  %s2703_s1 = inlined_call_operand.vmem [shape: bf16[64,64], index: 1, kind: input, shape index: {}]   ;;  %s2704_s2 = inlined_call_operand.vmem [shape: f32[64,1], index: 2, kind: input, shape index: {}]   ;;  %s2705_s3 = inlined_call_operand.hbm [shape: f32[2,64,1024], index: 3, kind: output, shape index: {}]  }
   0x1   :  { %10 = vsyncpa [#allocation3 + $0x1], 0 }
   0x2   :  { %11 = vsyncpa [#allocation4], 0 }
   0x3   :  { %13 = vsyncpa [#allocation4 + $0x1], 0  ;;  %s1660_s12 = smov 0   ;;  %s1662_s13 = smov 0  }
   0x4   :  { %s1664_s14 = smov 0   ;;  %s1666_s15 = smov 0  }
   0x5   :  { %s1668_s16 = smov 0   ;;  %s1670_s17 = smov 0  }
   0x6 LB: > { %s1350_s18 = sadd.s32 4294967295, %s1633_s17   ;;  %s1351_s19 = sadd.s32 4294967294, %s1633_s17   ;;  %s1633_s17 = sphi %s1670_s17, %s19_s17   ;;  %s1629_s16 = sphi %s1668_s16, %s2714_s16   ;;  %s1625_s15 = sphi %s1666_s15, %s2713_s15   ;;  %s1621_s14 = sphi %s1664_s14, %s2712_s14   ;;  %s1617_s13 = sphi %s1662_s13, %s2711_s13   ;;  %s1613_s12 = sphi %s1660_s12, %s2710_s12  }
   0x7   : > { %s31_s20 = sadd.s32 1, %s1629_s16  ;;  %s40_s21 = sadd.s32 1, %s1621_s14 }
   0x8   : > { %p33_p0 = scmp.ge.s32.totalorder %s31_s20, 2  ;;  %p47_p1 = scmp.ne.s32.totalorder %s1621_s14, %s1617_s13 }
   0x9   : > { %p48_p2 = scmp.eq.s32.totalorder %s1633_s17, 0  ;;  %p53_p3 = scmp.ne.s32.totalorder %s1617_s13, %s1613_s12 }
   0xa   : > { %s2716_s20 = smov (%p33_p0, %s31_s20), 0  ;;  %p54_p5 = scmp.eq.s32.totalorder %s1350_s18, 0 }
   0xb   : > { %p1701_p4 = por %p48_p2, %p47_p1  ;;  %s35_s23 = ssub.s32 %s1629_s16, %s2716_s20 }
   0xc   : > { %p121_p6 = scmp.eq.s32.totalorder %s1350_s18, 1  ;;  %p38_p7 = scmp.eq.s32.totalorder %s35_s23, 0 }
   0xd   : > { %p1707_p8 = por %p54_p5, %p53_p3  ;;  %p127_p10 = scmp.eq.s32.totalorder %s1351_s19, 1 }
   0xe   : > { %p1711_p9 = por %p121_p6, %p47_p1  ;;  %p1353_p12 = scmp.ge.s32.totalorder %s1633_s17, 2 }
   0xf   : > { %s1716_s26 = scalar_select %p38_p7, %s1621_s14, %s40_s21  }
  0x10   : > { %p1718_p11 = por %p127_p10, %p53_p3  ;;  %p1431_p13 = scmp.lt.s32.totalorder %s1633_s17, 2 }
  0x11   : > { %s153_s28 = sand.u32 1, %s1621_s14   ;;  %s1413_s30 = sshll.u32 %s1629_s16, 9 }
  0x12   : > { %s1354_s29 = sshll.u32 %s153_s28, 9  ;;  %s164_s6 = scalar_lea.hbm %s2702_s0, %s1413_s30 }
  0x13   : > { %s157_s7 = scalar_lea.vmem [#allocation2], %s1354_s29  ;;  %s165_s9 = sshll.u32 %s164_s6, 4  ;;  %s166_s9 = int_to_ptr.hbm [resolvable:$true] %s165_s9 }
  0x14   : > { %s167_s8 = sshll.u32 %s157_s7, 4  ;;  %p1424_p0 = pnand %p1431_p13, %p1701_p4  ;;  %s168_s8 = int_to_ptr.vmem [resolvable:$true] %s167_s8 }
  0x15   : > { %p1357_p1 = scmp.ge.s32.totalorder %s1633_s17, 1  ;;  %s154_s10 = scalar_lea.sflag [#allocation3], %s153_s28 }
  0x16   : > { %s1635_s11 = smov 1024   ;;  %s1636_s18 = smov 64  }
  0x17   : > { %1426 = dma.hbm_to_vmem [thread:$0]  (!%p1424_p0), %s166_s9, 8192, %s168_s8, %s154_s10, %s1635_s11, %s1635_s11, %s1636_s18  }
  0x18   : > { %p175_p2 = scmp.lt.s32.totalorder %s1633_s17, 3 }
  0x1a   : > { %p176_p3 = pnand %p1357_p1, %p175_p2 }
  0x1b   : > { %s1734_s19 = sand.u32 (!%p176_p3), 1, %s1617_s13  }
  0x1c   : > { %179 = sbr.rel (%p176_p3) target bundleno = 416 (0x1a0), region = 32  ;;  %s1358_s21 = sshll.u32 (!%p176_p3), %s1734_s19, 9 }
  0x1d   : > { %s182_s23 = scalar_lea.sflag (!%p176_p3), [#allocation3], %s1734_s19  ;;  %s1740_s22 = scalar_lea.vmem (!%p176_p3), [#allocation2], %s1358_s21 }
  0x21   : > { %1604 = dma.done.wait (%p1707_p8), %s182_s23, 8192  }
  0x22   : > { %1606 = vsyncadd (%p1707_p8), %s182_s23, 4294959104  ;;  %v1747_v0 = vld [vmem:[%s1740_s22] sm:$0xff]  ;;  %v1779_v12 = vld [vmem:[%s1740_s22 + $0x8] sm:$0xff]  ;;  %vm936_vm8 = vcmask 523264   ;;  %s2520_s9 = scalar_lea.vmem [#allocation5], %s1358_s21  ;;  %s1418_s21 = sshll.u32 %s1625_s15, 9 }
  0x23   : > { %v1750_v1 = vld [vmem:[%s1740_s22 + $0x40] sm:$0xff]  ;;  %v380_v7 = vmul.f32 %v1747_v0, %v1747_v0  ;;  %v1785_v16 = vld [vmem:[%s1740_s22 + $0x48] sm:$0xff]  ;;  %v381_v21 = vmul.f32 %v1779_v12, %v1779_v12  ;;  %v1810_v28 = vld [vmem:[%s1740_s22 + $0x10] sm:$0xff]  ;;  %s1259_s18 = scalar_lea.hbm %s2705_s3, %s1418_s21  ;;  %s1260_s23 = sshll.u32 %s2520_s9, 4  ;;  %s1261_s23 = int_to_ptr.vmem [resolvable:$true] %s1260_s23 }
  0x24   : > { %v1753_v2 = vld [vmem:[%s1740_s22 + $0x80] sm:$0xff]  ;;  %v276_v6 = vadd.f32 %v1750_v1, %v1747_v0  ;;  %v388_v8 = vmul.f32 %v1750_v1, %v1750_v1  ;;  %v1788_v17 = vld [vmem:[%s1740_s22 + $0x88] sm:$0xff]  ;;  %v289_v20 = vadd.f32 %v1785_v16, %v1779_v12  ;;  %v389_v22 = vmul.f32 %v1785_v16, %v1785_v16  ;;  %v1813_v29 = vld [vmem:[%s1740_s22 + $0x50] sm:$0xff]  ;;  %s1246_s24 = scalar_lea.sflag [#allocation4], %s1734_s19  ;;  %s1571_s4 = scalar_lea.hbm %s2705_s3, 1024 }
  0x25   : > { %v1756_v3 = vld [vmem:[%s1740_s22 + $0xc0] sm:$0xff]  ;;  %v396_v9 = vmul.f32 %v1753_v2, %v1753_v2  ;;  %v1791_v18 = vld [vmem:[%s1740_s22 + $0xc8] sm:$0xff]  ;;  %v397_v27 = vmul.f32 %v1788_v17, %v1788_v17  ;;  %v1823_v34 = vld [vmem:[%s1740_s22 + $0x90] sm:$0xff]  ;;  %v302_v40 = vadd.f32 %v1813_v29, %v1810_v28  ;;  %v382_v44 = vmul.f32 %v1810_v28, %v1810_v28 }
  0x26   : > { %v1759_v4 = vld [vmem:[%s1740_s22 + $0x100] sm:$0xff]  ;;  %v277_v13 = vadd.f32 %v276_v6, %v1753_v2  ;;  %v404_v14 = vmul.f32 %v1756_v3, %v1756_v3  ;;  %v444_v15 = vadd.f32 %v388_v8, %v380_v7  ;;  %v1805_v26 = vld [vmem:[%s1740_s22 + $0x108] sm:$0xff]  ;;  %v290_v32 = vadd.f32 %v289_v20, %v1788_v17  ;;  %v1838_v43 = vld [vmem:[%s1740_s22 + $0xd0] sm:$0xff] }
  0x27   : > { %v1762_v5 = vld [vmem:[%s1740_s22 + $0x140] sm:$0xff]  ;;  %v412_v19 = vmul.f32 %v1759_v4, %v1759_v4  ;;  %v405_v33 = vmul.f32 %v1791_v18, %v1791_v18  ;;  %v1827_v37 = vld [vmem:[%s1740_s22 + $0x148] sm:$0xff]  ;;  %v457_v39 = vadd.f32 %v389_v22, %v381_v21  ;;  %v413_v42 = vmul.f32 %v1805_v26, %v1805_v26  ;;  %v1855_v54 = vld [vmem:[%s1740_s22 + $0x110] sm:$0xff] }
  0x28   : > { %v1773_v10 = vld [vmem:[%s1740_s22 + $0x180] sm:$0xff]  ;;  %v278_v23 = vadd.f32 %v277_v13, %v1756_v3  ;;  %v420_v24 = vmul.f32 %v1762_v5, %v1762_v5  ;;  %v445_v25 = vadd.f32 %v444_v15, %v396_v9  ;;  %v1830_v38 = vld [vmem:[%s1740_s22 + $0x188] sm:$0xff]  ;;  %v291_v41 = vadd.f32 %v290_v32, %v1791_v18  ;;  %v1862_v60 = vld [vmem:[%s1740_s22 + $0x18] sm:$0xff] }
  0x29   : > { %v1776_v11 = vld [vmem:[%s1740_s22 + $0x1c0] sm:$0xff]  ;;  %v428_v30 = vmul.f32 %v1773_v10, %v1773_v10  ;;  %v390_v45 = vmul.f32 %v1813_v29, %v1813_v29  ;;  %v1846_v48 = vld [vmem:[%s1740_s22 + $0x1c8] sm:$0xff]  ;;  %v458_v49 = vadd.f32 %v457_v39, %v397_v27  ;;  %v303_v50 = vadd.f32 %v302_v40, %v1823_v34  ;;  %v1865_v61 = vld [vmem:[%s1740_s22 + $0x58] sm:$0xff] }
  0x2a   : > { %v436_v31 = vmul.f32 %v1776_v11, %v1776_v11  ;;  %v279_v35 = vadd.f32 %v278_v23, %v1759_v4  ;;  %v446_v36 = vadd.f32 %v445_v25, %v404_v14  ;;  %v292_v51 = vadd.f32 %v291_v41, %v1805_v26  ;;  %v1871_v6 = vld [vmem:[%s1740_s22 + $0x150] sm:$0xff] }
  0x2b   : > { %v421_v52 = vmul.f32 %v1827_v37, %v1827_v37  ;;  %v429_v53 = vmul.f32 %v1830_v38, %v1830_v38  ;;  %v398_v55 = vmul.f32 %v1823_v34, %v1823_v34  ;;  %v459_v58 = vadd.f32 %v458_v49, %v405_v33  ;;  %v1882_v21 = vld [vmem:[%s1740_s22 + $0x190] sm:$0xff]  ;;  %v1890_v33 = vld [vmem:[%s1740_s22 + $0xd8] sm:$0xff] }
  0x2c   : > { %v280_v46 = vadd.f32 %v279_v35, %v1762_v5  ;;  %v447_v47 = vadd.f32 %v446_v36, %v412_v19  ;;  %v304_v59 = vadd.f32 %v303_v50, %v1838_v43  ;;  %v293_v62 = vadd.f32 %v292_v51, %v1827_v37  ;;  %v1878_v19 = vld [vmem:[%s1740_s22 + $0x98] sm:$0xff]  ;;  %v1894_v36 = vld [vmem:[%s1740_s22 + $0x1d0] sm:$0xff] }
  0x2d   : > { %v437_v63 = vmul.f32 %v1846_v48, %v1846_v48  ;;  %v406_v7 = vmul.f32 %v1838_v43, %v1838_v43  ;;  %v470_v8 = vadd.f32 %v390_v45, %v382_v44  ;;  %v460_v14 = vadd.f32 %v459_v58, %v413_v42  ;;  %v1908_v58 = vld [vmem:[%s1740_s22 + $0x158] sm:$0xff] }
  0x2e   : > { %v281_v56 = vadd.f32 %v280_v46, %v1773_v10  ;;  %v448_v57 = vadd.f32 %v447_v47, %v420_v24  ;;  %v305_v15 = vadd.f32 %v304_v59, %v1855_v54  ;;  %v294_v20 = vadd.f32 %v293_v62, %v1830_v38  ;;  %v1901_v46 = vld [vmem:[%s1740_s22 + $0x118] sm:$0xff] }
  0x2f   : > { %v414_v22 = vmul.f32 %v1855_v54, %v1855_v54  ;;  %v471_v23 = vadd.f32 %v470_v8, %v398_v55  ;;  %v315_v24 = vadd.f32 %v1865_v61, %v1862_v60  ;;  %v422_v39 = vmul.f32 %v1871_v6, %v1871_v6 }
  0x30   : > { %v282_v9 = vadd.f32 %v281_v56, %v1776_v11  ;;  %v449_v13 = vadd.f32 %v448_v57, %v428_v30  ;;  %v461_v30 = vadd.f32 %v460_v14, %v421_v52  ;;  %v306_v32 = vadd.f32 %v305_v15, %v1871_v6  ;;  %v1914_v15 = vld [vmem:[%s1740_s22 + $0x198] sm:$0xff] }
  0x31   : > { %v295_v35 = vadd.f32 %v294_v20, %v1846_v48  ;;  %v472_v40 = vadd.f32 %v471_v23, %v406_v7  ;;  %v316_v41 = vadd.f32 %v315_v24, %v1878_v19  ;;  %v430_v49 = vmul.f32 %v1882_v21, %v1882_v21 }
  0x32   : > { %v283_v25 = vrot.slane %v282_v9, 4  ;;  %v450_v27 = vadd.f32 %v449_v13, %v436_v31  ;;  %v462_v45 = vadd.f32 %v461_v30, %v429_v53  ;;  %v307_v31 = vadd.f32 %v306_v32, %v1882_v21  ;;  %v1918_v30 = vld [vmem:[%s1740_s22 + $0x1d8] sm:$0xff] }
  0x33   : > { %v296_v47 = vrot.slane %v295_v35, 4  ;;  %v473_v50 = vadd.f32 %v472_v40, %v414_v22  ;;  %v317_v51 = vadd.f32 %v316_v41, %v1890_v33  ;;  %v438_v59 = vmul.f32 %v1894_v36, %v1894_v36 }
  0x34   : > { %v284_v42 = vadd.f32 %v283_v25, %v282_v9  ;;  %v451_v44 = vrot.slane %v450_v27, 4  ;;  %v463_v56 = vadd.f32 %v462_v45, %v437_v63  ;;  %v308_v57 = vadd.f32 %v307_v31, %v1894_v36 }
  0x35   : > { %v297_v53 = vadd.f32 %v296_v47, %v295_v35  ;;  %v474_v62 = vadd.f32 %v473_v50, %v422_v39  ;;  %v318_v7 = vadd.f32 %v317_v51, %v1901_v46  ;;  %v383_v40 = vmul.f32 %v1862_v60, %v1862_v60 }
  0x36   : > { %v285_v52 = vrot.slane %v284_v42, 2  ;;  %v452_v55 = vadd.f32 %v451_v44, %v450_v27  ;;  %v464_v13 = vrot.slane %v463_v56, 4  ;;  %v309_v14 = vrot.slane %v308_v57, 4 }
  0x37   : > { %v298_v20 = vrot.slane %v297_v53, 2  ;;  %v475_v63 = vadd.f32 %v474_v62, %v430_v49  ;;  %v319_v22 = vadd.f32 %v318_v7, %v1908_v58  ;;  %v391_v50 = vmul.f32 %v1865_v61, %v1865_v61 }
  0x38   : > { %v286_v8 = vadd.f32 %v285_v52, %v284_v42  ;;  %v453_v9 = vrot.slane %v452_v55, 2  ;;  %v465_v25 = vadd.f32 %v464_v13, %v463_v56  ;;  %v310_v27 = vadd.f32 %v309_v14, %v308_v57 }
  0x39   : > { %v299_v32 = vadd.f32 %v298_v20, %v297_v53  ;;  %v476_v35 = vadd.f32 %v475_v63, %v438_v59  ;;  %v320_v39 = vadd.f32 %v319_v22, %v1914_v15  ;;  %v483_v22 = vadd.f32 %v391_v50, %v383_v40 }
  0x3a   : > { %v287_v23 = vrot.slane %v286_v8, 1  ;;  %v454_v24 = vadd.f32 %v453_v9, %v452_v55  ;;  %v466_v44 = vrot.slane %v465_v25, 2  ;;  %v311_v45 = vrot.slane %v310_v27, 2 }
  0x3b   : > { %v300_v31 = vrot.slane %v299_v32, 1  ;;  %v477_v47 = vrot.slane %v476_v35, 4  ;;  %v321_v49 = vadd.f32 %v320_v39, %v1918_v30  ;;  %v415_v40 = vmul.f32 %v1901_v46, %v1901_v46 }
  0x3c   : > { %v288_v41 = vadd.f32 %v287_v23, %v286_v8  ;;  %v455_v42 = vrot.slane %v454_v24, 1  ;;  %v467_v55 = vadd.f32 %v466_v44, %v465_v25  ;;  %v312_v56 = vadd.f32 %v311_v45, %v310_v27 }
  0x3d   : > { %v301_v57 = vadd.f32 %v300_v31, %v299_v32  ;;  %v478_v53 = vadd.f32 %v477_v47, %v476_v35  ;;  %v322_v7 = vrot.slane %v321_v49, 4  ;;  %v399_v8 = vmul.f32 %v1878_v19, %v1878_v19 }
  0x3e   : > { %v456_v51 = vadd.f32 %v455_v42, %v454_v24  ;;  %v1926_v52 = vmul.f32 0.015625, %v288_v41  ;;  %v468_v9 = vrot.slane %v467_v55, 1  ;;  %v313_v14 = vrot.slane %v312_v56, 1 }
  0x3f   : > { %v1932_v13 = vmul.f32 0.015625, %v301_v57  ;;  %v479_v20 = vrot.slane %v478_v53, 2  ;;  %v407_v35 = vmul.f32 %v1890_v33, %v1890_v33  ;;  %v484_v39 = vadd.f32 %v483_v22, %v399_v8 }
  0x40   : > { %v556_v59 = vmul.f32 0.015625, %v456_v51  ;;  %v564_v62 = vmul.f32 %v1926_v52, %v1926_v52  ;;  %v469_v23 = vadd.f32 %v468_v9, %v467_v55  ;;  %v314_v25 = vadd.f32 %v313_v14, %v312_v56 }
  0x41   : > { %v565_v24 = vmul.f32 %v1932_v13, %v1932_v13  ;;  %v480_v27 = vadd.f32 %v479_v20, %v478_v53  ;;  %v323_v45 = vadd.f32 %v322_v7, %v321_v49  ;;  %v485_v51 = vadd.f32 %v484_v39, %v407_v35 }
  0x42   : > { %v572_v63 = vsub.f32 %v556_v59, %v564_v62  ;;  %v557_v41 = vmul.f32 0.015625, %v469_v23  ;;  %v1938_v44 = vmul.f32 0.015625, %v314_v25  ;;  %v423_v53 = vmul.f32 %v1908_v58, %v1908_v58 }
  0x43   : > { %v481_v42 = vrot.slane %v480_v27, 1  ;;  %v324_v57 = vrot.slane %v323_v45, 2  ;;  %v486_v59 = vadd.f32 %v485_v51, %v415_v40  ;;  %v431_v49 = vmul.f32 %v1914_v15, %v1914_v15 }
  0x44   : > { %v580_v32 = vmax.f32 %v572_v63, 0.0  ;;  %v573_v31 = vsub.f32 %v557_v41, %v565_v24  ;;  %v566_v50 = vmul.f32 %v1938_v44, %v1938_v44  ;;  %v439_v14 = vmul.f32 %v1918_v30, %v1918_v30 }
  0x45   : > { %v482_v47 = vadd.f32 %v481_v42, %v480_v27  ;;  %v325_v9 = vadd.f32 %v324_v57, %v323_v45  ;;  %v487_v20 = vadd.f32 %v486_v59, %v423_v53 }
  0x46   : > { %1489 = vrsqrt.f32 %v580_v32  ;;  %v581_v55 = vmax.f32 %v573_v31, 0.0  ;;  %vm595_vm0 = vcmp.eq.f32.partialorder %v580_v32, inf  ;;  %v598_v51 = vand.u32 2147483648, %v580_v32 }
  0x47   : > { %v558_v56 = vmul.f32 0.015625, %v482_v47  ;;  %v488_v23 = vadd.f32 %v487_v20, %v431_v49  ;;  %v326_v27 = vrot.slane %v325_v9, 1  ;;  %vm597_vm1 = vcmp.eq.f32.partialorder %v580_v32, 0.0 }
  0x48   : > { %1491 = vrsqrt.f32 %v581_v55  ;;  %vm607_vm2 = vcmp.eq.f32.partialorder %v581_v55, inf  ;;  %vm609_vm3 = vcmp.eq.f32.partialorder %v581_v55, 0.0 }
  0x49   : > { %v574_v7 = vsub.f32 %v558_v56, %v566_v50  ;;  %v489_v35 = vadd.f32 %v488_v23, %v439_v14  ;;  %v327_v45 = vadd.f32 %v326_v27, %v325_v9  ;;  %v610_v9 = vand.u32 2147483648, %v581_v55 }
  0x4b   : > { %v1950_v63 = vmax.f32 %v574_v7, 0.0  ;;  %v490_v42 = vrot.slane %v489_v35, 4  ;;  %v1954_v20 = vmul.f32 0.015625, %v327_v45 }
  0x4c   : > { %v1490_v62 = vpop.eup %1489 }
  0x4d   : > { %v589_v8 = vmul.f32 %v1490_v62, %v580_v32  ;;  %1493 = vrsqrt.f32 %v1950_v63  ;;  %v491_v47 = vadd.f32 %v490_v42, %v489_v35  ;;  %v567_v42 = vmul.f32 %v1954_v20, %v1954_v20 }
  0x4e   : > { %v1492_v24 = vpop.eup %1491  ;;  %vm619_vm4 = vcmp.eq.f32.partialorder %v1950_v63, inf  ;;  %vm621_vm5 = vcmp.eq.f32.partialorder %v1950_v63, 0.0 }
  0x4f   : > { %v590_v22 = vmul.f32 %v1490_v62, %v589_v8  ;;  %v601_v39 = vmul.f32 %v1492_v24, %v581_v55  ;;  %v492_v59 = vrot.slane %v491_v47, 2 }
  0x51   : > { %v591_v25 = vmul.f32 0.5, %v590_v22  ;;  %v602_v40 = vmul.f32 %v1492_v24, %v601_v39  ;;  %v493_v14 = vadd.f32 %v492_v59, %v491_v47  ;;  %v756_v47 = vsub.f32 %v1776_v11, %v1926_v52 }
  0x52   : > { %v757_v11 = vsub.f32 %v1846_v48, %v1932_v13  ;;  %v758_v48 = vsub.f32 %v1894_v36, %v1938_v44  ;;  %v741_v36 = vsub.f32 %v1827_v37, %v1932_v13 }
  0x53   : > { %v592_v41 = vsub.f32 1.5, %v591_v25  ;;  %v1494_v50 = vpop.eup %1493  ;;  %v603_v56 = vmul.f32 0.5, %v602_v40  ;;  %v494_v27 = vrot.slane %v493_v14, 1  ;;  %v748_v40 = vsub.f32 %v1773_v10, %v1926_v52 }
  0x54   : > { %v613_v53 = vmul.f32 %v1494_v50, %v1950_v63 }
  0x55   : > { %v593_v31 = vmul.f32 %v1490_v62, %v592_v41  ;;  %v604_v49 = vsub.f32 1.5, %v603_v56  ;;  %v495_v41 = vadd.f32 %v494_v27, %v493_v14  ;;  %v622_v56 = vand.u32 2147483648, %v1950_v63 }
  0x56   : > { %v614_v8 = vmul.f32 %v1494_v50, %v613_v53  ;;  %v750_v14 = vsub.f32 %v1882_v21, %v1938_v44  ;;  %v732_v21 = vsub.f32 %v1759_v4, %v1926_v52  ;;  %v733_v27 = vsub.f32 %v1805_v26, %v1932_v13 }
  0x57   : > { %v594_v57 = vmul.f32 %v593_v31, %v580_v32  ;;  %v605_v23 = vmul.f32 %v1492_v24, %v604_v49  ;;  %v559_v24 = vmul.f32 0.015625, %v495_v41 }
  0x58   : > { %v615_v25 = vmul.f32 0.5, %v614_v8 }
  0x59   : > { %v596_v7 = vsel %vm595_vm0, %v580_v32, %v594_v57  ;;  %v606_v35 = vmul.f32 %v605_v23, %v581_v55  ;;  %v1983_v23 = vld [vmem:[%s1740_s22 + $0x70] sm:$0xff] }
  0x5a   : > { %v599_v22 = vsel %vm597_vm1, %v598_v51, %v596_v7  ;;  %v616_v39 = vsub.f32 1.5, %v615_v25  ;;  %v740_v25 = vsub.f32 %v1762_v5, %v1926_v52  ;;  %v2012_v26 = vmul.f32 %v1983_v23, %v1983_v23 }
  0x5b   : > { %v684_v62 = vadd.f32 1e-05, %v599_v22  ;;  %v608_v32 = vsel %vm607_vm2, %v581_v55, %v606_v35  ;;  %v575_v55 = vsub.f32 %v559_v24, %v567_v42  ;;  %v1980_v22 = vld [vmem:[%s1740_s22 + $0x30] sm:$0xff]  ;;  %v716_v24 = vsub.f32 %v1753_v2, %v1926_v52 }
  0x5c   : > { %v611_v31 = vsel %vm609_vm3, %v610_v9, %v608_v32  ;;  %v617_v45 = vmul.f32 %v1494_v50, %v616_v39  ;;  %v749_v50 = vsub.f32 %v1830_v38, %v1932_v13  ;;  %v759_v9 = vsub.f32 %v1918_v30, %v1954_v20 }
  0x5d   : > { %1495 = vrcp.f32 %v684_v62  ;;  %v685_v51 = vadd.f32 1e-05, %v611_v31  ;;  %v1973_v59 = vmax.f32 %v575_v55, 0.0  ;;  %v2002_v35 = vadd.f32 %v1983_v23, %v1980_v22 }
  0x5e   : > { %v618_v57 = vmul.f32 %v617_v45, %v1950_v63  ;;  %v2008_v5 = vmul.f32 %v1980_v22, %v1980_v22  ;;  %v734_v45 = vsub.f32 %v1855_v54, %v1938_v44  ;;  %v717_v55 = vsub.f32 %v1788_v17, %v1932_v13 }
  0x5f   : > { %1497 = vrcp.f32 %v685_v51  ;;  %v726_v17 = vsub.f32 %v1838_v43, %v1938_v44  ;;  %vm631_vm6 = vcmp.eq.f32.partialorder %v1973_v59, inf  ;;  %vm633_vm7 = vcmp.eq.f32.partialorder %v1973_v59, 0.0 }
  0x60   : > { %v620_v53 = vsel %vm619_vm4, %v1950_v63, %v618_v57  ;;  %1499 = vrsqrt.f32 %v1973_v59  ;;  %v751_v63 = vsub.f32 %v1914_v15, %v1954_v20  ;;  %v742_v57 = vsub.f32 %v1871_v6, %v1938_v44 }
  0x61   : > { %v623_v8 = vsel %vm621_vm5, %v622_v56, %v620_v53 }
  0x62   : > { %v686_v38 = vadd.f32 1e-05, %v623_v8 }
  0x63   : > { %v1966_v10 = vpop.eup %1495 }
  0x64   : > { %v812_v49 = vmul.f32 %v1966_v10, %v748_v40  ;;  %v820_v7 = vmul.f32 %v1966_v10, %v756_v47  ;;  %1501 = vrcp.f32 %v686_v38  ;;  %v796_v41 = vmul.f32 %v1966_v10, %v732_v21 }
  0x65   : > { %v1498_v39 = vpop.eup %1497  ;;  %v804_v4 = vmul.f32 %v1966_v10, %v740_v25  ;;  %v724_v47 = vsub.f32 %v1756_v3, %v1926_v52  ;;  %v780_v54 = vmul.f32 %v1966_v10, %v716_v24  ;;  %v718_v3 = vsub.f32 %v1823_v34, %v1938_v44 }
  0x66   : > { %v860_v62 = vpack.c.bf16 %v820_v7, %v812_v49  ;;  %v813_v42 = vmul.f32 %v1498_v39, %v749_v50  ;;  %v821_v37 = vmul.f32 %v1498_v39, %v757_v11  ;;  %v797_v32 = vmul.f32 %v1498_v39, %v733_v27  ;;  %v1500_v51 = vpop.eup %1499 }
  0x67   : > { %v805_v40 = vmul.f32 %v1498_v39, %v741_v36  ;;  %v852_v31 = vpack.c.bf16 %v804_v4, %v796_v41  ;;  %v725_v50 = vsub.f32 %v1791_v18, %v1932_v13  ;;  %v625_v11 = vmul.f32 %v1500_v51, %v1973_v59 }
  0x68   : > { %953 = vmatpush.bf16.msra.mxu0 %v860_v62  ;;  %v861_v56 = vpack.c.bf16 %v821_v37, %v813_v42  ;;  %v788_v2 = vmul.f32 %v1966_v10, %v724_v47  ;;  %v781_v6 = vmul.f32 %v1498_v39, %v717_v55  ;;  %v634_v4 = vand.u32 2147483648, %v1973_v59 }
  0x69   : > { %v853_v49 = vpack.c.bf16 %v805_v40, %v797_v32  ;;  %v789_v7 = vmul.f32 %v1498_v39, %v725_v50  ;;  %v626_v38 = vmul.f32 %v1500_v51, %v625_v11  ;;  %v701_v32 = vsub.f32 %v1779_v12, %v1932_v13  ;;  %v2069_v50 = vld [vmem:[%s1740_s22 + $0x38] sm:$0xff] }
  0x6a   : > { %v1502_v53 = vpop.eup %1501  ;;  %982 = vmatpush.bf16.msra.mxu1 %v861_v56  ;;  %v844_v25 = vpack.c.bf16 %v788_v2, %v780_v54  ;;  %v709_v40 = vsub.f32 %v1785_v16, %v1932_v13  ;;  %v735_v12 = vsub.f32 %v1901_v46, %v1954_v20  ;;  %v743_v13 = vsub.f32 %v1908_v58, %v1954_v20  ;;  %v2072_v11 = vld [vmem:[%s1740_s22 + $0x78] sm:$0xff] }
  0x6b   : > { %v814_v8 = vmul.f32 %v1502_v53, %v750_v14  ;;  %v822_v18 = vmul.f32 %v1502_v53, %v758_v48  ;;  %v798_v62 = vmul.f32 %v1502_v53, %v734_v45  ;;  %v806_v21 = vmul.f32 %v1502_v53, %v742_v57  ;;  %v2058_v57 = vld [vmem:[%s1740_s22 + $0xf0] sm:$0xff] }
  0x6c   : > { %954 = vmatpush.bf16.msra.mxu0 %v852_v31  ;;  %v627_v34 = vmul.f32 0.5, %v626_v38  ;;  %v845_v36 = vpack.c.bf16 %v789_v7, %v781_v6  ;;  %v782_v41 = vmul.f32 %v1502_v53, %v718_v3  ;;  %v790_v43 = vmul.f32 %v1502_v53, %v726_v17  ;;  %v2079_v3 = vld [vmem:[%s1740_s22 + $0x130] sm:$0xff]  ;;  %v2090_v17 = vld [vmem:[%s1740_s22 + $0xb8] sm:$0xff] }
  0x6d   : > { %v862_v27 = vpack.c.bf16 %v822_v18, %v814_v8  ;;  %v700_v14 = vsub.f32 %v1747_v0, %v1926_v52  ;;  %v708_v48 = vsub.f32 %v1750_v1, %v1926_v52  ;;  %v854_v37 = vpack.c.bf16 %v806_v21, %v798_v62  ;;  %v2051_v52 = vld [vmem:[%s1740_s22 + $0xb0] sm:$0xff] }
  0x6e   : > { %983 = vmatpush.bf16.msra.mxu1 %v853_v49  ;;  %v628_v42 = vsub.f32 1.5, %v627_v34  ;;  %v702_v0 = vsub.f32 %v1810_v28, %v1938_v44  ;;  %v710_v1 = vsub.f32 %v1813_v29, %v1938_v44  ;;  %v765_v47 = vmul.f32 %v1498_v39, %v701_v32  ;;  %v2095_v18 = vld [vmem:[%s1740_s22 + $0x170] sm:$0xff] }
  0x6f   : > { %1011 = vmatpush.bf16.msra.mxu2 %v862_v27  ;;  %v764_v31 = vmul.f32 %v1966_v10, %v700_v14  ;;  %v772_v45 = vmul.f32 %v1966_v10, %v708_v48  ;;  %v773_v16 = vmul.f32 %v1498_v39, %v709_v40  ;;  %v846_v44 = vpack.c.bf16 %v790_v43, %v782_v41  ;;  %v2064_v39 = vld [vmem:[%s2703_s1] sm:$0xff]  ;;  %v2109_v27 = vld [vmem:[%s1740_s22 + $0x1f0] sm:$0xff]  ;;  %v2136_v40 = vld [vmem:[%s1740_s22 + $0x138] sm:$0xff] }
  0x70   : > { %955 = vmatpush.bf16.msra.mxu0 %v844_v25  ;;  %v629_v24 = vmul.f32 %v1500_v51, %v628_v42  ;;  %v766_v28 = vmul.f32 %v1502_v53, %v702_v0  ;;  %v774_v56 = vmul.f32 %v1502_v53, %v710_v1  ;;  %v355_v55 = vadd.f32 %v2002_v35, %v2051_v52  ;;  %v2125_v48 = vld [vmem:[%s1740_s22 + $0x20] sm:$0xff] }
  0x71   : > { %v836_v10 = vpack.c.bf16 %v772_v45, %v764_v31  ;;  %v837_v51 = vpack.c.bf16 %v773_v16, %v765_v47  ;;  %v719_v54 = vsub.f32 %v1878_v19, %v1954_v20  ;;  %v727_v2 = vsub.f32 %v1890_v33, %v1954_v20  ;;  %v2128_v42 = vld [vmem:[%s1740_s22 + $0x60] sm:$0xff]  ;;  %v2139_v31 = vld [vmem:[%s1740_s22 + $0x178] sm:$0xff]  ;;  %v2215_v19 = vld [vmem:[%s1740_s22 + $0x28] sm:$0xff] }
  0x72   : > { %984 = vmatpush.bf16.msra.mxu1 %v845_v36  ;;  %v630_v29 = vmul.f32 %v629_v24, %v1973_v59  ;;  %v402_v53 = vmul.f32 %v2051_v52, %v2051_v52  ;;  %v838_v49 = vpack.c.bf16 %v774_v56, %v766_v28  ;;  %v703_v6 = vsub.f32 %v1862_v60, %v1954_v20  ;;  %v2113_v36 = vld [vmem:[%s1740_s22 + $0xf8] sm:$0xff] }
  0x73   : > { %1012 = vmatpush.bf16.msra.mxu2 %v854_v37  ;;  %v356_v7 = vadd.f32 %v355_v55, %v2058_v57  ;;  %v410_v38 = vmul.f32 %v2058_v57, %v2058_v57  ;;  %v522_v62 = vadd.f32 %v2012_v26, %v2008_v5  ;;  %v367_v21 = vadd.f32 %v2072_v11, %v2069_v50  ;;  %v2148_v47 = vld [vmem:[%s1740_s22 + $0x1b8] sm:$0xff] }
  0x74   : > { %956 = vmatpush.bf16.msra.mxu0 %v836_v10  ;;  %v632_v35 = vsel %vm631_vm6, %v1973_v59, %v630_v29  ;;  %v2106_v59 = vld [vmem:[%s1740_s22 + $0x1b0] sm:$0xff]  ;;  %v387_v5 = vmul.f32 %v2069_v50, %v2069_v50  ;;  %v395_v26 = vmul.f32 %v2072_v11, %v2072_v11  ;;  %v711_v41 = vsub.f32 %v1865_v61, %v1954_v20  ;;  %v2152_v10 = vld [vmem:[%s1740_s22 + $0xa0] sm:$0xff]  ;;  %v2156_v56 = vld [vmem:[%s1740_s22 + $0x1f8] sm:$0xff] }
  0x75   : > { %v635_v8 = vsel %vm633_vm7, %v634_v4, %v632_v35  ;;  %v357_v34 = vadd.f32 %v356_v7, %v2079_v3  ;;  %v418_v4 = vmul.f32 %v2079_v3, %v2079_v3  ;;  %v523_v43 = vadd.f32 %v522_v62, %v402_v53  ;;  %v2168_v7 = vld [vmem:[%s1740_s22 + $0xe0] sm:$0xff]  ;;  %v2256_v20 = vld [vmem:[%s1740_s22 + $0x168] sm:$0xff] }
  0x76   : > { %985 = vmatpush.bf16.msra.mxu1 %v837_v51  ;;  %v687_v25 = vadd.f32 1e-05, %v635_v8  ;;  %v368_v14 = vadd.f32 %v367_v21, %v2090_v17  ;;  %v426_v32 = vmul.f32 %v2095_v18, %v2095_v18  ;;  %v403_v45 = vmul.f32 %v2090_v17, %v2090_v17 }
  0x77   : > { %1013 = vmatpush.bf16.msra.mxu2 %v846_v44  ;;  %1376 = vmatmul.msk.bf16.vlgmr.msra.gmra.mxu0 %vm936_vm8, %v2064_v39  ;;  %v358_v37 = vadd.f32 %v357_v34, %v2095_v18  ;;  %v434_v0 = vmul.f32 %v2106_v59, %v2106_v59  ;;  %v442_v1 = vmul.f32 %v2109_v27, %v2109_v27 }
  0x78   : > { %1503 = vrcp.f32 %v687_v25  ;;  %v524_v24 = vadd.f32 %v523_v43, %v410_v38  ;;  %v369_v16 = vadd.f32 %v368_v14, %v2113_v36  ;;  %v411_v29 = vmul.f32 %v2113_v36, %v2113_v36 }
  0x79   : > { %1380 = vmatmul.msk.bf16.vlgmr.msra.gmra.mxu1 %vm936_vm8, %v2064_v39  ;;  %v359_v28 = vadd.f32 %v358_v37, %v2106_v59  ;;  %v535_v44 = vadd.f32 %v395_v26, %v387_v5  ;;  %v328_v51 = vadd.f32 %v2128_v42, %v2125_v48  ;;  %v419_v35 = vmul.f32 %v2136_v40, %v2136_v40 }
  0x7a   : > { %v525_v55 = vadd.f32 %v524_v24, %v418_v4  ;;  %v370_v53 = vadd.f32 %v369_v16, %v2136_v40  ;;  %v435_v38 = vmul.f32 %v2148_v47, %v2148_v47  ;;  %v443_v34 = vmul.f32 %v2156_v56, %v2156_v56 }
  0x7b   : > { %1014 = vmatpush.bf16.msra.mxu2 %v838_v49  ;;  %v427_v49 = vmul.f32 %v2139_v31, %v2139_v31  ;;  %v360_v8 = vadd.f32 %v359_v28, %v2109_v27  ;;  %v536_v62 = vadd.f32 %v535_v44, %v403_v45  ;;  %v329_v21 = vadd.f32 %v328_v51, %v2152_v10  ;;  %v2184_v45 = vld [vmem:[%s1740_s22 + $0x120] sm:$0xff] }
  0x7c   : > { %v526_v25 = vadd.f32 %v525_v55, %v426_v32  ;;  %v384_v5 = vmul.f32 %v2125_v48, %v2125_v48  ;;  %v392_v26 = vmul.f32 %v2128_v42, %v2128_v42  ;;  %v371_v14 = vadd.f32 %v370_v53, %v2139_v31  ;;  %v2200_v44 = vld [vmem:[%s1740_s22 + $0x160] sm:$0xff] }
  0x7d   : > { %v361_v43 = vrot.slane %v360_v8, 4  ;;  %v537_v37 = vadd.f32 %v536_v62, %v411_v29  ;;  %v330_v32 = vadd.f32 %v329_v21, %v2168_v7  ;;  %v400_v30 = vmul.f32 %v2152_v10, %v2152_v10  ;;  %v2225_v21 = vld [vmem:[%s1740_s22 + $0xa8] sm:$0xff] }
  0x7e   : > { %1384 = vmatmul.msk.bf16.vlgmr.msra.gmra.mxu2 %vm936_vm8, %v2064_v39  ;;  %v1504_v4 = vpop.eup %1503  ;;  %v408_v46 = vmul.f32 %v2168_v7, %v2168_v7  ;;  %v424_v55 = vmul.f32 %v2200_v44, %v2200_v44 }
  0x7f   : > { %v815_v24 = vmul.f32 %v1504_v4, %v751_v63  ;;  %v823_v16 = vmul.f32 %v1504_v4, %v759_v9  ;;  %v799_v28 = vmul.f32 %v1504_v4, %v735_v12  ;;  %v807_v29 = vmul.f32 %v1504_v4, %v743_v13  ;;  %v2218_v13 = vld [vmem:[%s1740_s22 + $0x68] sm:$0xff] }
  0x80   : > { %v783_v51 = vmul.f32 %v1504_v4, %v719_v54  ;;  %v791_v15 = vmul.f32 %v1504_v4, %v727_v2  ;;  %v362_v58 = vadd.f32 %v361_v43, %v360_v8  ;;  %v527_v9 = vadd.f32 %v526_v25, %v434_v0 }
  0x81   : > { %v863_v63 = vpack.c.bf16 %v823_v16, %v815_v24  ;;  %v416_v12 = vmul.f32 %v2184_v45, %v2184_v45  ;;  %v372_v54 = vadd.f32 %v371_v14, %v2148_v47  ;;  %v538_v2 = vadd.f32 %v537_v37, %v419_v35  ;;  %v2229_v24 = vld [vmem:[%s1740_s22 + $0x1a0] sm:$0xff] }
  0x82   : > { %v847_v33 = vpack.c.bf16 %v791_v15, %v783_v51  ;;  %v855_v53 = vpack.c.bf16 %v807_v29, %v799_v28  ;;  %v363_v8 = vrot.slane %v362_v58, 2  ;;  %v528_v0 = vadd.f32 %v527_v9, %v442_v1  ;;  %v2238_v28 = vld [vmem:[%s1740_s22 + $0xe8] sm:$0xff] }
  0x83   : > { %1040 = vmatpush.bf16.msra.mxu3 %v863_v63  ;;  %v331_v62 = vadd.f32 %v330_v32, %v2184_v45  ;;  %v373_v25 = vadd.f32 %v372_v54, %v2156_v56  ;;  %v539_v43 = vadd.f32 %v538_v2, %v427_v49  ;;  %v496_v14 = vadd.f32 %v392_v26, %v384_v5  ;;  %v2241_v49 = vld [vmem:[%s1740_s22 + $0x1e0] sm:$0xff] }
  0x84   : > { %v341_v35 = vadd.f32 %v2218_v13, %v2215_v19  ;;  %v767_v37 = vmul.f32 %v1504_v4, %v703_v6  ;;  %v364_v16 = vadd.f32 %v363_v8, %v362_v58  ;;  %v529_v1 = vrot.slane %v528_v0, 4  ;;  %v2249_v58 = vld [vmem:[%s1740_s22 + $0x128] sm:$0xff] }
  0x85   : > { %v332_v32 = vadd.f32 %v331_v62, %v2200_v44  ;;  %v374_v29 = vrot.slane %v373_v25, 4  ;;  %v540_v51 = vadd.f32 %v539_v43, %v435_v38  ;;  %v497_v15 = vadd.f32 %v496_v14, %v400_v30 }
  0x86   : > { %v342_v5 = vadd.f32 %v341_v35, %v2225_v21  ;;  %v775_v60 = vmul.f32 %v1504_v4, %v711_v41  ;;  %v365_v6 = vrot.slane %v364_v16, 1  ;;  %v530_v26 = vadd.f32 %v529_v1, %v528_v0  ;;  %v2262_v1 = vld [vmem:[%s1740_s22 + $0x1a8] sm:$0xff] }
  0x87   : > { %1041 = vmatpush.bf16.msra.mxu3 %v855_v53  ;;  %v333_v63 = vadd.f32 %v332_v32, %v2229_v24  ;;  %v375_v9 = vadd.f32 %v374_v29, %v373_v25  ;;  %v541_v54 = vadd.f32 %v540_v51, %v443_v34  ;;  %v498_v38 = vadd.f32 %v497_v15, %v408_v46 }
  0x88   : > { %v343_v2 = vadd.f32 %v342_v5, %v2238_v28  ;;  %v366_v30 = vadd.f32 %v365_v6, %v364_v16  ;;  %v531_v8 = vrot.slane %v530_v26, 2  ;;  %v432_v61 = vmul.f32 %v2229_v24, %v2229_v24 }
  0x89   : > { %v334_v53 = vadd.f32 %v333_v63, %v2241_v49  ;;  %v376_v41 = vrot.slane %v375_v9, 2  ;;  %v542_v4 = vrot.slane %v541_v54, 4  ;;  %v499_v0 = vadd.f32 %v498_v38, %v416_v12 }
  0x8a   : > { %v344_v62 = vadd.f32 %v343_v2, %v2249_v58  ;;  %v839_v34 = vpack.c.bf16 %v775_v60, %v767_v37  ;;  %v532_v46 = vadd.f32 %v531_v8, %v530_v26  ;;  %v2259_v25 = vmul.f32 0.015625, %v366_v30  ;;  %v2272_v60 = vld [vmem:[%s1740_s22 + $0x1e8] sm:$0xff]  ;;  %s1262_s22 = sshll.u32 %s1259_s18, 4  ;;  %s1263_s22 = int_to_ptr.hbm [resolvable:$true] %s1262_s22 }
  0x8b   : > { %1042 = vmatpush.bf16.msra.mxu3 %v847_v33  ;;  %v335_v43 = vrot.slane %v334_v53, 4  ;;  %v377_v14 = vadd.f32 %v376_v41, %v375_v9  ;;  %v543_v35 = vadd.f32 %v542_v4, %v541_v54  ;;  %v500_v16 = vadd.f32 %v499_v0, %v424_v55  ;;  %s1565_s28 = sshra.s32 %s1263_s22, 4  ;;  %s1566_s28 = int_to_ptr.hbm [resolvable:$true] %s1565_s28 }
  0x8c   : > { %v345_v32 = vadd.f32 %v344_v62, %v2256_v20  ;;  %v533_v29 = vrot.slane %v532_v46, 1  ;;  %v440_v12 = vmul.f32 %v2241_v49, %v2241_v49  ;;  %v385_v33 = vmul.f32 %v2215_v19, %v2215_v19  ;;  %s1567_s15 = scalar_lea.hbm %s1566_s28, 512  ;;  %p1572_p7 = scmp.lt.s32.totalorder %s1566_s28, %s2705_s3 }
  0x8d   : > { %v336_v51 = vadd.f32 %v335_v43, %v334_v53  ;;  %v570_v37 = vmul.f32 %v2259_v25, %v2259_v25  ;;  %v378_v15 = vrot.slane %v377_v14, 1  ;;  %v544_v5 = vrot.slane %v543_v35, 2  ;;  %p1568_p4 = scmp.ne.s32.totalorder %s1566_s28, %s1567_s15  ;;  %p1573_p8 = scmp.lt.s32.totalorder %s1571_s4, %s1567_s15 }
  0x8e   : > { %v393_v55 = vmul.f32 %v2218_v13, %v2218_v13  ;;  %v534_v6 = vadd.f32 %v533_v29, %v532_v46  ;;  %v501_v63 = vadd.f32 %v500_v16, %v432_v61  ;;  %v346_v9 = vadd.f32 %v345_v32, %v2262_v1  ;;  %v2292_v16 = vld [vmem:[%s2703_s1 + $0x8] sm:$0xff] }
  0x8f   : > { %1043 = vmatpush.bf16.msra.mxu3 %v839_v34  ;;  %v337_v26 = vrot.slane %v336_v51, 2  ;;  %v379_v54 = vadd.f32 %v378_v15, %v377_v14  ;;  %v545_v38 = vadd.f32 %v544_v5, %v543_v35  ;;  %v401_v2 = vmul.f32 %v2225_v21, %v2225_v21  ;;  %v868_v35 = vld [vmem:[%s2704_s2] sm:$0xff]  ;;  %1377 = vmatmul.msk.bf16.gmra.mxu0 %vm936_vm8, %v2292_v16  ;;  %p1569_p5 = pnand %p1568_p4, %p1711_p9  ;;  %p1574_p10 = por %p1573_p8, %p1572_p7 }
  0x90   : > { %v562_v30 = vmul.f32 0.015625, %v534_v6  ;;  %v502_v53 = vadd.f32 %v501_v63, %v440_v12  ;;  %v347_v41 = vadd.f32 %v346_v9, %v2272_v60  ;;  %v409_v61 = vmul.f32 %v2238_v28, %v2238_v28  ;;  %1381 = vmatmul.msk.bf16.gmra.mxu1 %vm936_vm8, %v2292_v16  ;;  %1385 = vmatmul.msk.bf16.gmra.mxu2 %vm936_vm8, %v2292_v16 }
  0x91   : > { %v338_v8 = vadd.f32 %v337_v26, %v336_v51  ;;  %v546_v4 = vrot.slane %v545_v38, 1  ;;  %v2282_v0 = vmul.f32 0.015625, %v379_v54  ;;  %v509_v62 = vadd.f32 %v393_v55, %v385_v33  ;;  %p1570_p6 = pneg %p1569_p5 }
  0x92   : > { %1388 = vmatmul.msk.bf16.vlgmr.msra.gmra.mxu3 %vm936_vm8, %v2064_v39  ;;  %v578_v34 = vsub.f32 %v562_v30, %v570_v37  ;;  %v503_v43 = vrot.slane %v502_v53, 4  ;;  %v348_v14 = vrot.slane %v347_v41, 4  ;;  %v417_v15 = vmul.f32 %v2249_v58, %v2249_v58 }
  0x93   : > { %v339_v46 = vrot.slane %v338_v8, 1  ;;  %v547_v32 = vadd.f32 %v546_v4, %v545_v38  ;;  %v571_v29 = vmul.f32 %v2282_v0, %v2282_v0  ;;  %v510_v51 = vadd.f32 %v509_v62, %v401_v2  ;;  %v869_v62 = vld [vmem:[%s2704_s2 + $0x8] sm:$0xff]  ;;  %p1575_p13 = pnand %p1574_p10, %p1570_p6 }
  0x94   : > { %v2296_v12 = vmax.f32 %v578_v34, 0.0  ;;  %v504_v33 = vadd.f32 %v503_v43, %v502_v53  ;;  %v349_v37 = vadd.f32 %v348_v14, %v347_v41  ;;  %v1637_v5 = vmov 0  }
  0x95   : > { %1486 = vset.pattern.permute.xlu0 %v1637_v5  ;;  %v563_v55 = vmul.f32 0.015625, %v547_v32  ;;  %v511_v6 = vadd.f32 %v510_v51, %v409_v61  ;;  %v340_v26 = vadd.f32 %v339_v46, %v338_v8  ;;  %v425_v63 = vmul.f32 %v2256_v20, %v2256_v20  ;;  %1487 = vset.pattern.permute.xlu1 %v1637_v5 }
  0x96   : > { %878 = vperm.xlu0 %1486, %v868_v35   ;;  %1505 = vrsqrt.f32 %v2296_v12  ;;  %v505_v54 = vrot.slane %v504_v33, 2  ;;  %v350_v38 = vrot.slane %v349_v37, 2  ;;  %1488 = vset.pattern.permute.xlu2 %v1637_v5  ;;  %v433_v2 = vmul.f32 %v2262_v1, %v2262_v1 }
  0x97   : > { %v579_v9 = vsub.f32 %v563_v55, %v571_v29  ;;  %v512_v30 = vadd.f32 %v511_v6, %v417_v15  ;;  %v2313_v4 = vmul.f32 0.015625, %v340_v26  ;;  %v441_v8 = vmul.f32 %v2272_v60, %v2272_v60 }
  0x98   : > { %v506_v41 = vadd.f32 %v505_v54, %v504_v33  ;;  %v351_v34 = vadd.f32 %v350_v38, %v349_v37  ;;  %v870_v33 = vld [vmem:[%s2704_s2 + $0x10] sm:$0xff]  ;;  %vm667_vm9 = vcmp.eq.f32.partialorder %v2296_v12, inf  ;;  %vm669_vm10 = vcmp.eq.f32.partialorder %v2296_v12, 0.0 }
  0x99   : > { %v2311_v53 = vmax.f32 %v579_v9, 0.0  ;;  %v513_v61 = vadd.f32 %v512_v30, %v425_v63  ;;  %v568_v29 = vmul.f32 %v2313_v4, %v2313_v4  ;;  %888 = vperm.xlu1 %1487, %v870_v33   ;;  %v2333_v38 = vld [vmem:[%s2703_s1 + $0x10] sm:$0xff] }
  0x9a   : > { %v507_v43 = vrot.slane %v506_v41, 1  ;;  %v352_v5 = vrot.slane %v351_v34, 1 }
  0x9b   : > { %1507 = vrsqrt.f32 %v2311_v53  ;;  %v514_v14 = vadd.f32 %v513_v61, %v433_v2  ;;  %vm679_vm11 = vcmp.eq.f32.partialorder %v2311_v53, inf  ;;  %vm681_vm12 = vcmp.eq.f32.partialorder %v2311_v53, 0.0 }
  0x9c   : > { %v1506_v46 = vpop.eup %1505  ;;  %v508_v32 = vadd.f32 %v507_v43, %v506_v41  ;;  %v353_v30 = vadd.f32 %v352_v5, %v351_v34  ;;  %v670_v43 = vand.u32 2147483648, %v2296_v12  ;;  %v871_v34 = vld [vmem:[%s2704_s2 + $0x18] sm:$0xff] }
  0x9d   : > { %v661_v35 = vmul.f32 %v1506_v46, %v2296_v12  ;;  %v515_v51 = vadd.f32 %v514_v14, %v441_v8 }
  0x9e   : > { %883 = vperm.xlu0 %1486, %v869_v62   ;;  %v560_v55 = vmul.f32 0.015625, %v508_v32  ;;  %v2351_v32 = vmul.f32 0.015625, %v353_v30 }
  0x9f   : > { %v662_v15 = vmul.f32 %v1506_v46, %v661_v35  ;;  %v516_v37 = vrot.slane %v515_v51, 4  ;;  %1378 = vmatmul.msk.bf16.gmra.mxu0 %vm936_vm8, %v2333_v38 }
  0xa0   : > { %v576_v9 = vsub.f32 %v560_v55, %v568_v29  ;;  %1382 = vmatmul.msk.bf16.gmra.mxu1 %vm936_vm8, %v2333_v38  ;;  %1386 = vmatmul.msk.bf16.gmra.mxu2 %vm936_vm8, %v2333_v38 }
  0xa1   : > { %v1508_v6 = vpop.eup %1507  ;;  %v663_v26 = vmul.f32 0.5, %v662_v15  ;;  %v517_v54 = vadd.f32 %v516_v37, %v515_v51  ;;  %893 = vperm.xlu1 %1487, %v871_v34   ;;  %v682_v37 = vand.u32 2147483648, %v2311_v53 }
  0xa2   : > { %1389 = vmatmul.msk.bf16.gmra.mxu3 %vm936_vm8, %v2292_v16  ;;  %v673_v63 = vmul.f32 %v1508_v6, %v2311_v53  ;;  %v2335_v8 = vmax.f32 %v576_v9, 0.0 }
  0xa3   : > { %v664_v2 = vsub.f32 1.5, %v663_v26  ;;  %v518_v61 = vrot.slane %v517_v54, 2 }
  0xa4   : > { %v674_v41 = vmul.f32 %v1508_v6, %v673_v63  ;;  %1509 = vrsqrt.f32 %v2335_v8  ;;  %v569_v63 = vmul.f32 %v2351_v32, %v2351_v32  ;;  %vm643_vm13 = vcmp.eq.f32.partialorder %v2335_v8, inf }
  0xa5   : > { %v665_v62 = vmul.f32 %v1506_v46, %v664_v2  ;;  %v519_v46 = vadd.f32 %v518_v61, %v517_v54  ;;  %vm645_vm14 = vcmp.eq.f32.partialorder %v2335_v8, 0.0 }
  0xa6   : > { %v675_v14 = vmul.f32 0.5, %v674_v41 }
  0xa7   : > { %v666_v35 = vmul.f32 %v665_v62, %v2296_v12  ;;  %v520_v33 = vrot.slane %v519_v46, 1  ;;  %v754_v62 = vsub.f32 %v2106_v59, %v2259_v25  ;;  %v755_v59 = vsub.f32 %v2148_v47, %v2282_v0 }
  0xa8   : > { %v676_v29 = vsub.f32 1.5, %v675_v14  ;;  %v646_v47 = vand.u32 2147483648, %v2335_v8 }
  0xa9   : > { %v668_v51 = vsel %vm667_vm9, %v2296_v12, %v666_v35  ;;  %v521_v26 = vadd.f32 %v520_v33, %v519_v46  ;;  %v763_v33 = vsub.f32 %v2156_v56, %v2282_v0 }
  0xaa   : > { %v671_v15 = vsel %vm669_vm10, %v670_v43, %v668_v51  ;;  %v677_v5 = vmul.f32 %v1508_v6, %v676_v29  ;;  %v1510_v9 = vpop.eup %1509  ;;  %v762_v43 = vsub.f32 %v2109_v27, %v2259_v25 }
  0xab   : > { %v690_v55 = vadd.f32 1e-05, %v671_v15  ;;  %v637_v12 = vmul.f32 %v1510_v9, %v2335_v8  ;;  %v561_v2 = vmul.f32 0.015625, %v521_v26  ;;  %v738_v15 = vsub.f32 %v2079_v3, %v2259_v25 }
  0xac   : > { %v678_v54 = vmul.f32 %v677_v5, %v2311_v53  ;;  %v739_v3 = vsub.f32 %v2136_v40, %v2282_v0  ;;  %v747_v26 = vsub.f32 %v2139_v31, %v2282_v0  ;;  %v730_v40 = vsub.f32 %v2058_v57, %v2259_v25 }
  0xad   : > { %1511 = vrcp.f32 %v690_v55  ;;  %v638_v41 = vmul.f32 %v1510_v9, %v637_v12  ;;  %v577_v61 = vsub.f32 %v561_v2, %v569_v63  ;;  %v746_v55 = vsub.f32 %v2095_v18, %v2259_v25 }
  0xae   : > { %v680_v6 = vsel %vm679_vm11, %v2311_v53, %v678_v54  ;;  %v2373_v53 = vld [vmem:[%s2703_s1 + $0x18] sm:$0xff]  ;;  %v722_v54 = vsub.f32 %v2051_v52, %v2259_v25  ;;  %v723_v31 = vsub.f32 %v2090_v17, %v2282_v0  ;;  %v731_v12 = vsub.f32 %v2113_v36, %v2282_v0 }
  0xaf   : > { %v683_v30 = vsel %vm681_vm12, %v682_v37, %v680_v6  ;;  %v639_v34 = vmul.f32 0.5, %v638_v41  ;;  %v2366_v35 = vmax.f32 %v577_v61, 0.0  ;;  %1379 = vmatmul.msk.bf16.gmra.mxu0 %vm936_vm8, %v2373_v53 }
  0xb0   : > { %v691_v14 = vadd.f32 1e-05, %v683_v30  ;;  %1383 = vmatmul.msk.bf16.gmra.mxu1 %vm936_vm8, %v2373_v53  ;;  %1387 = vmatmul.msk.bf16.gmra.mxu2 %vm936_vm8, %v2373_v53 }
  0xb1   : > { %v640_v29 = vsub.f32 1.5, %v639_v34  ;;  %vm655_vm15 = vcmp.eq.f32.partialorder %v2366_v35, inf  ;;  %vm657_vm0 = vcmp.eq.f32.partialorder %v2366_v35, 0.0 }
  0xb2   : > { %1390 = vmatmul.msk.bf16.gmra.mxu3 %vm936_vm8, %v2333_v38  ;;  %1513 = vrcp.f32 %v691_v14 }
  0xb3   : > { %v2375_v46 = vpop.eup %1511  ;;  %1515 = vrsqrt.f32 %v2366_v35  ;;  %v641_v5 = vmul.f32 %v1510_v9, %v640_v29 }
  0xb4   : > { %v818_v27 = vmul.f32 %v2375_v46, %v754_v62  ;;  %v826_v51 = vmul.f32 %v2375_v46, %v762_v43  ;;  %v802_v56 = vmul.f32 %v2375_v46, %v738_v15  ;;  %v810_v18 = vmul.f32 %v2375_v46, %v746_v55 }
  0xb5   : > { %v642_v63 = vmul.f32 %v641_v5, %v2335_v8  ;;  %v786_v17 = vmul.f32 %v2375_v46, %v722_v54  ;;  %v794_v29 = vmul.f32 %v2375_v46, %v730_v40  ;;  %v760_v15 = vsub.f32 %v2241_v49, %v2313_v4 }
  0xb6   : > { %v866_v37 = vpack.c.bf16 %v826_v51, %v818_v27  ;;  %v858_v61 = vpack.c.bf16 %v810_v18, %v802_v56  ;;  %v714_v55 = vsub.f32 %v1983_v23, %v2259_v25  ;;  %v715_v56 = vsub.f32 %v2072_v11, %v2282_v0 }
  0xb7   : > { %v644_v41 = vsel %vm643_vm13, %v2335_v8, %v642_v63  ;;  %v850_v8 = vpack.c.bf16 %v794_v29, %v786_v17  ;;  %v744_v49 = vsub.f32 %v2200_v44, %v2313_v4  ;;  %v720_v44 = vsub.f32 %v2152_v10, %v2313_v4  ;;  %v875_v10 = vld [vmem:[%s2704_s2 + $0x38] sm:$0xff] }
  0xb8   : > { %v1514_v9 = vpop.eup %1513  ;;  %1127 = vmatpush.bf16.msrb.mxu2 %v866_v37  ;;  %v647_v62 = vsel %vm645_vm14, %v646_v47, %v644_v41  ;;  %v706_v47 = vsub.f32 %v1980_v22, %v2259_v25  ;;  %v707_v37 = vsub.f32 %v2069_v50, %v2282_v0  ;;  %v778_v23 = vmul.f32 %v2375_v46, %v714_v55 }
  0xb9   : > { %v1516_v2 = vpop.eup %1515  ;;  %v819_v6 = vmul.f32 %v1514_v9, %v755_v59  ;;  %v827_v30 = vmul.f32 %v1514_v9, %v763_v33  ;;  %v803_v43 = vmul.f32 %v1514_v9, %v739_v3  ;;  %v811_v14 = vmul.f32 %v1514_v9, %v747_v26  ;;  %913 = vperm.xlu1 %1487, %v875_v10  }
  0xba   : > { %v649_v52 = vmul.f32 %v1516_v2, %v2366_v35  ;;  %v688_v34 = vadd.f32 1e-05, %v647_v62  ;;  %v787_v59 = vmul.f32 %v1514_v9, %v723_v31  ;;  %v795_v27 = vmul.f32 %v1514_v9, %v731_v12  ;;  %v874_v31 = vld [vmem:[%s2704_s2 + $0x30] sm:$0xff]  ;;  %v872_v12 = vld [vmem:[%s2704_s2 + $0x20] sm:$0xff] }
  0xbb   : > { %v867_v57 = vpack.c.bf16 %v827_v30, %v819_v6  ;;  %v859_v51 = vpack.c.bf16 %v811_v14, %v803_v43  ;;  %v752_v33 = vsub.f32 %v2229_v24, %v2313_v4  ;;  %v736_v24 = vsub.f32 %v2184_v45, %v2313_v4  ;;  %908 = vperm.xlu0 %1486, %v874_v31  }
  0xbc   : > { %v650_v36 = vmul.f32 %v1516_v2, %v649_v52  ;;  %1128 = vmatpush.bf16.msrb.mxu2 %v858_v61  ;;  %1517 = vrcp.f32 %v688_v34  ;;  %v851_v26 = vpack.c.bf16 %v795_v27, %v787_v59  ;;  %v770_v22 = vmul.f32 %v2375_v46, %v706_v47  ;;  %898 = vperm.xlu2 %1488, %v872_v12  }
  0xbd   : > { %1156 = vmatpush.bf16.msrb.mxu3 %v867_v57  ;;  %v771_v25 = vmul.f32 %v1514_v9, %v707_v37  ;;  %v779_v63 = vmul.f32 %v1514_v9, %v715_v56  ;;  %v658_v45 = vand.u32 2147483648, %v2366_v35  ;;  %v728_v0 = vsub.f32 %v2168_v7, %v2313_v4 }
  0xbe   : > { %v651_v5 = vmul.f32 0.5, %v650_v36  ;;  %v842_v46 = vpack.c.bf16 %v778_v23, %v770_v22  ;;  %v704_v61 = vsub.f32 %v2125_v48, %v2313_v4  ;;  %v712_v62 = vsub.f32 %v2128_v42, %v2313_v4  ;;  %v873_v48 = vld [vmem:[%s2704_s2 + $0x28] sm:$0xff] }
  0xbf   : > { %v843_v7 = vpack.c.bf16 %v779_v63, %v771_v25  ;;  %v753_v42 = vsub.f32 %v2262_v1, %v2351_v32  ;;  %v761_v4 = vsub.f32 %v2272_v60, %v2351_v32  ;;  %v737_v29 = vsub.f32 %v2249_v58, %v2351_v32 }
  0xc0   : > { %v652_v3 = vsub.f32 1.5, %v651_v5  ;;  %1129 = vmatpush.bf16.msrb.mxu2 %v850_v8  ;;  %v745_v36 = vsub.f32 %v2256_v20, %v2351_v32  ;;  %v721_v59 = vsub.f32 %v2225_v21, %v2351_v32  ;;  %v729_v27 = vsub.f32 %v2238_v28, %v2351_v32 }
  0xc1   : > { %1157 = vmatpush.bf16.msrb.mxu3 %v859_v51  ;;  %v705_v51 = vsub.f32 %v2215_v19, %v2351_v32  ;;  %v713_v1 = vsub.f32 %v2218_v13, %v2351_v32 }
  0xc2   : > { %v653_v50 = vmul.f32 %v1516_v2, %v652_v3  ;;  %1391 = vmatmul.msk.bf16.gmra.mxu3 %vm936_vm8, %v2373_v53  ;;  %v1518_v11 = vpop.eup %1517 }
  0xc3   : > { %v816_v18 = vmul.f32 %v1518_v11, %v752_v33  ;;  %v824_v9 = vmul.f32 %v1518_v11, %v760_v15  ;;  %v800_v40 = vmul.f32 %v1518_v11, %v736_v24  ;;  %v808_v2 = vmul.f32 %v1518_v11, %v744_v49 }
  0xc4   : > { %v654_v54 = vmul.f32 %v653_v50, %v2366_v35  ;;  %1130 = vmatpush.bf16.msrb.mxu2 %v842_v46  ;;  %v784_v14 = vmul.f32 %v1518_v11, %v720_v44  ;;  %v792_v57 = vmul.f32 %v1518_v11, %v728_v0  ;;  %v768_v34 = vmul.f32 %v1518_v11, %v704_v61 }
  0xc5   : > { %1158 = vmatpush.bf16.msrb.mxu3 %v851_v26  ;;  %v864_v6 = vpack.c.bf16 %v824_v9, %v816_v18  ;;  %v856_v43 = vpack.c.bf16 %v808_v2, %v800_v40  ;;  %v776_v17 = vmul.f32 %v1518_v11, %v712_v62  ;;  %903 = vperm.xlu2 %1488, %v873_v48  }
  0xc6   : > { %v656_v30 = vsel %vm655_vm15, %v2366_v35, %v654_v54  ;;  %v848_v35 = vpack.c.bf16 %v792_v57, %v784_v14 }
  0xc7   : > { %v659_v41 = vsel %vm657_vm0, %v658_v45, %v656_v30  ;;  %1069 = vmatpush.bf16.msrb.mxu0 %v864_v6  ;;  %1400 = vmatmul.msk.bf16.vlgmr.msrb.gmra.mxu2 %vm936_vm8, %v2064_v39  ;;  %v840_v8 = vpack.c.bf16 %v776_v17, %v768_v34 }
  0xc8   : > { %v689_v52 = vadd.f32 1e-05, %v659_v41 }
  0xc9   : > { %1159 = vmatpush.bf16.msrb.mxu3 %v843_v7 }
  0xca   : > { %1519 = vrcp.f32 %v689_v52 }
  0xcb   : > { %1070 = vmatpush.bf16.msrb.mxu0 %v856_v43 }
  0xcf   : > { %1071 = vmatpush.bf16.msrb.mxu0 %v848_v35 }
  0xd0   : > { %v1520_v60 = vpop.eup %1519 }
  0xd1   : > { %v817_v58 = vmul.f32 %v1520_v60, %v753_v42  ;;  %v825_v33 = vmul.f32 %v1520_v60, %v761_v4  ;;  %v801_v15 = vmul.f32 %v1520_v60, %v737_v29  ;;  %v809_v20 = vmul.f32 %v1520_v60, %v745_v36 }
  0xd2   : > { %v785_v5 = vmul.f32 %v1520_v60, %v721_v59  ;;  %v793_v47 = vmul.f32 %v1520_v60, %v729_v27  ;;  %v769_v21 = vmul.f32 %v1520_v60, %v705_v51  ;;  %v777_v55 = vmul.f32 %v1520_v60, %v713_v1  ;;  %1404 = vmatmul.msk.bf16.vlgmr.msrb.gmra.mxu3 %vm936_vm8, %v2064_v39 }
  0xd3   : > { %v865_v28 = vpack.c.bf16 %v825_v33, %v817_v58  ;;  %1072 = vmatpush.bf16.msrb.mxu0 %v840_v8  ;;  %v857_v13 = vpack.c.bf16 %v809_v20, %v801_v15 }
  0xd4   : > { %v849_v19 = vpack.c.bf16 %v793_v47, %v785_v5  ;;  %v841_v37 = vpack.c.bf16 %v777_v55, %v769_v21 }
  0xd5   : > { %1098 = vmatpush.bf16.msrb.mxu1 %v865_v28 }
  0xd6   : > { %1392 = vmatmul.msk.bf16.vlgmr.msrb.gmra.mxu0 %vm936_vm8, %v2064_v39 }
  0xd7   : > { %1401 = vmatmul.msk.bf16.gmra.mxu2 %vm936_vm8, %v2292_v16 }
  0xd9   : > { %1099 = vmatpush.bf16.msrb.mxu1 %v857_v13 }
  0xdd   : > { %1100 = vmatpush.bf16.msrb.mxu1 %v849_v19 }
  0xe1   : > { %1101 = vmatpush.bf16.msrb.mxu1 %v841_v37 }
  0xe2   : > { %1405 = vmatmul.msk.bf16.gmra.mxu3 %vm936_vm8, %v2292_v16 }
  0xe4   : > { %1396 = vmatmul.msk.bf16.vlgmr.msrb.gmra.mxu1 %vm936_vm8, %v2064_v39 }
  0xe6   : > { %1393 = vmatmul.msk.bf16.gmra.mxu0 %vm936_vm8, %v2292_v16 }
  0xe7   : > { %1402 = vmatmul.msk.bf16.gmra.mxu2 %vm936_vm8, %v2333_v38 }
  0xf2   : > { %1406 = vmatmul.msk.bf16.gmra.mxu3 %vm936_vm8, %v2333_v38 }
  0xf4   : > { %1397 = vmatmul.msk.bf16.gmra.mxu1 %vm936_vm8, %v2292_v16  ;;  %v958_v39 = vpop.f32.mrf.mxu0 }
  0xf6   : > { %1394 = vmatmul.msk.bf16.gmra.mxu0 %vm936_vm8, %v2333_v38  ;;  %v987_v32 = vpop.f32.mrf.mxu1 }
  0xf7   : > { %1403 = vmatmul.msk.bf16.gmra.mxu2 %vm936_vm8, %v2373_v53 }
  0xfc   : > { %v960_v16 = vpop.f32.mrf.mxu0 }
  0xfe   : > { %v989_v22 = vpop.f32.mrf.mxu1 }
 0x101   : > { %v1016_v56 = vpop.f32.mrf.mxu2 }
 0x102   : > { %1407 = vmatmul.msk.bf16.gmra.mxu3 %vm936_vm8, %v2373_v53 }
 0x104   : > { %1398 = vmatmul.msk.bf16.gmra.mxu1 %vm936_vm8, %v2333_v38 }
 0x106   : > { %1395 = vmatmul.msk.bf16.gmra.mxu0 %vm936_vm8, %v2373_v53 }
 0x108   : > { %v2513_v3 = vpop.permute.xlu0 %878 }
 0x109   : > { %v959_v24 = vadd.f32 %v958_v39, %v2513_v3  ;;  %v988_v49 = vadd.f32 %v987_v32, %v2513_v3  ;;  %v1017_v26 = vadd.f32 %v1016_v56, %v2513_v3  ;;  %v1018_v38 = vpop.f32.mrf.mxu2 }
 0x10b   : > { %1181 = vst [vmem:[%s2520_s9] sm:$0xff] %v959_v24  ;;  %v2530_v11 = vpop.permute.xlu1 %888 }
 0x10c   : > { %1182 = vst [vmem:[%s2520_s9 + $0x8] sm:$0xff] %v988_v49  ;;  %v963_v45 = vpop.f32.mrf.mxu0 }
 0x10d   : > { %1183 = vst [vmem:[%s2520_s9 + $0x10] sm:$0xff] %v1017_v26  ;;  %v964_v44 = vadd.f32 %v963_v45, %v2530_v11  ;;  %v992_v0 = vpop.f32.mrf.mxu1 }
 0x10e   : > { %v993_v46 = vadd.f32 %v992_v0, %v2530_v11 }
 0x10f   : > { %1197 = vst [vmem:[%s2520_s9 + $0x80] sm:$0xff] %v964_v44 }
 0x110   : > { %v2525_v23 = vpop.permute.xlu0 %883  ;;  %1198 = vst [vmem:[%s2520_s9 + $0x88] sm:$0xff] %v993_v46 }
 0x111   : > { %v961_v25 = vadd.f32 %v960_v16, %v2525_v23  ;;  %v990_v63 = vadd.f32 %v989_v22, %v2525_v23  ;;  %v1019_v50 = vadd.f32 %v1018_v38, %v2525_v23 }
 0x113   : > { %1189 = vst [vmem:[%s2520_s9 + $0x40] sm:$0xff] %v961_v25  ;;  %v1021_v54 = vpop.f32.mrf.mxu2  ;;  %v2543_v40 = vpop.permute.xlu1 %893 }
 0x114   : > { %1190 = vst [vmem:[%s2520_s9 + $0x48] sm:$0xff] %v990_v63  ;;  %1399 = vmatmul.msk.bf16.gmra.mxu1 %vm936_vm8, %v2373_v53  ;;  %v1022_v31 = vadd.f32 %v1021_v54, %v2530_v11  ;;  %v965_v12 = vpop.f32.mrf.mxu0 }
 0x115   : > { %v1045_v18 = vpop.f32.mrf.mxu3  ;;  %1191 = vst [vmem:[%s2520_s9 + $0x50] sm:$0xff] %v1019_v50  ;;  %v994_v10 = vpop.f32.mrf.mxu1  ;;  %v966_v2 = vadd.f32 %v965_v12, %v2543_v40 }
 0x116   : > { %v1046_v9 = vadd.f32 %v1045_v18, %v2513_v3  ;;  %v995_v53 = vadd.f32 %v994_v10, %v2543_v40  ;;  %1199 = vst [vmem:[%s2520_s9 + $0x90] sm:$0xff] %v1022_v31  ;;  %v2553_v41 = vpop.permute.xlu2 %898 }
 0x117   : > { %1205 = vst [vmem:[%s2520_s9 + $0xc0] sm:$0xff] %v966_v2 }
 0x118   : > { %1184 = vst [vmem:[%s2520_s9 + $0x18] sm:$0xff] %v1046_v9 }
 0x119   : > { %1206 = vst [vmem:[%s2520_s9 + $0xc8] sm:$0xff] %v995_v53 }
 0x11b   : > { %v1023_v30 = vpop.f32.mrf.mxu2 }
 0x11c   : > { %v1024_v61 = vadd.f32 %v1023_v30, %v2543_v40  ;;  %v968_v62 = vpop.f32.mrf.mxu0 }
 0x11d   : > { %v1047_v7 = vpop.f32.mrf.mxu3  ;;  %v997_v52 = vpop.f32.mrf.mxu1  ;;  %v969_v43 = vadd.f32 %v968_v62, %v2553_v41 }
 0x11e   : > { %v1048_v6 = vadd.f32 %v1047_v7, %v2525_v23  ;;  %v998_v14 = vadd.f32 %v997_v52, %v2553_v41  ;;  %1207 = vst [vmem:[%s2520_s9 + $0xd0] sm:$0xff] %v1024_v61 }
 0x11f   : > { %1213 = vst [vmem:[%s2520_s9 + $0x100] sm:$0xff] %v969_v43  ;;  %v2563_v17 = vpop.permute.xlu2 %903 }
 0x120   : > { %1192 = vst [vmem:[%s2520_s9 + $0x58] sm:$0xff] %v1048_v6 }
 0x121   : > { %1214 = vst [vmem:[%s2520_s9 + $0x108] sm:$0xff] %v998_v14 }
 0x123   : > { %v1026_v34 = vpop.f32.mrf.mxu2 }
 0x124   : > { %v1027_v48 = vadd.f32 %v1026_v34, %v2553_v41  ;;  %v970_v42 = vpop.f32.mrf.mxu0 }
 0x125   : > { %v1050_v57 = vpop.f32.mrf.mxu3  ;;  %v999_v4 = vpop.f32.mrf.mxu1  ;;  %v971_v29 = vadd.f32 %v970_v42, %v2563_v17 }
 0x126   : > { %v1051_v35 = vadd.f32 %v1050_v57, %v2530_v11  ;;  %v1000_v36 = vadd.f32 %v999_v4, %v2563_v17  ;;  %1215 = vst [vmem:[%s2520_s9 + $0x110] sm:$0xff] %v1027_v48 }
 0x127   : > { %1221 = vst [vmem:[%s2520_s9 + $0x140] sm:$0xff] %v971_v29 }
 0x128   : > { %1200 = vst [vmem:[%s2520_s9 + $0x98] sm:$0xff] %v1051_v35 }
 0x129   : > { %1222 = vst [vmem:[%s2520_s9 + $0x148] sm:$0xff] %v1000_v36 }
 0x12b   : > { %v1028_v51 = vpop.f32.mrf.mxu2  ;;  %v2581_v21 = vpop.permute.xlu1 %913 }
 0x12c   : > { %v1029_v1 = vadd.f32 %v1028_v51, %v2563_v17  ;;  %v973_v60 = vpop.f32.mrf.mxu0 }
 0x12d   : > { %v1052_v59 = vpop.f32.mrf.mxu3  ;;  %v1002_v8 = vpop.f32.mrf.mxu1 }
 0x12e   : > { %v1053_v27 = vadd.f32 %v1052_v59, %v2543_v40  ;;  %1223 = vst [vmem:[%s2520_s9 + $0x150] sm:$0xff] %v1029_v1  ;;  %v2577_v15 = vpop.permute.xlu0 %908 }
 0x12f   : > { %v974_v20 = vadd.f32 %v973_v60, %v2577_v15  ;;  %v1003_v5 = vadd.f32 %v1002_v8, %v2577_v15 }
 0x130   : > { %1208 = vst [vmem:[%s2520_s9 + $0xd8] sm:$0xff] %v1053_v27 }
 0x131   : > { %1229 = vst [vmem:[%s2520_s9 + $0x180] sm:$0xff] %v974_v20 }
 0x132   : > { %1230 = vst [vmem:[%s2520_s9 + $0x188] sm:$0xff] %v1003_v5 }
 0x133   : > { %v1031_v47 = vpop.f32.mrf.mxu2 }
 0x134   : > { %v1032_v55 = vadd.f32 %v1031_v47, %v2577_v15  ;;  %v975_v28 = vpop.f32.mrf.mxu0 }
 0x135   : > { %v1055_v58 = vpop.f32.mrf.mxu3  ;;  %v1004_v19 = vpop.f32.mrf.mxu1  ;;  %v976_v37 = vadd.f32 %v975_v28, %v2581_v21 }
 0x136   : > { %v1056_v33 = vadd.f32 %v1055_v58, %v2553_v41  ;;  %v1005_v39 = vadd.f32 %v1004_v19, %v2581_v21  ;;  %1231 = vst [vmem:[%s2520_s9 + $0x190] sm:$0xff] %v1032_v55 }
 0x137   : > { %1237 = vst [vmem:[%s2520_s9 + $0x1c0] sm:$0xff] %v976_v37 }
 0x138   : > { %1216 = vst [vmem:[%s2520_s9 + $0x118] sm:$0xff] %v1056_v33 }
 0x139   : > { %1238 = vst [vmem:[%s2520_s9 + $0x1c8] sm:$0xff] %v1005_v39 }
 0x13b   : > { %v1033_v56 = vpop.f32.mrf.mxu2 }
 0x13c   : > { %v1034_v16 = vadd.f32 %v1033_v56, %v2581_v21 }
 0x13d   : > { %v1057_v13 = vpop.f32.mrf.mxu3 }
 0x13e   : > { %v1058_v32 = vadd.f32 %v1057_v13, %v2563_v17  ;;  %1239 = vst [vmem:[%s2520_s9 + $0x1d0] sm:$0xff] %v1034_v16 }
 0x140   : > { %1224 = vst [vmem:[%s2520_s9 + $0x158] sm:$0xff] %v1058_v32 }
 0x145   : > { %v1060_v24 = vpop.f32.mrf.mxu3 }
 0x146   : > { %v1061_v49 = vadd.f32 %v1060_v24, %v2577_v15 }
 0x148   : > { %1232 = vst [vmem:[%s2520_s9 + $0x198] sm:$0xff] %v1061_v49 }
 0x14a   : > { %v1132_v26 = vpop.f32.mrf.mxu2 }
 0x14b   : > { %v1133_v22 = vadd.f32 %v1132_v26, %v2513_v3 }
 0x14d   : > { %v1062_v38 = vpop.f32.mrf.mxu3  ;;  %1187 = vst [vmem:[%s2520_s9 + $0x30] sm:$0xff] %v1133_v22 }
 0x14e   : > { %v1063_v25 = vadd.f32 %v1062_v38, %v2581_v21 }
 0x150   : > { %1240 = vst [vmem:[%s2520_s9 + $0x1d8] sm:$0xff] %v1063_v25 }
 0x152   : > { %v1134_v63 = vpop.f32.mrf.mxu2 }
 0x153   : > { %v1074_v50 = vpop.f32.mrf.mxu0  ;;  %v1135_v45 = vadd.f32 %v1134_v63, %v2525_v23 }
 0x154   : > { %v1075_v44 = vadd.f32 %v1074_v50, %v2513_v3 }
 0x155   : > { %v1161_v0 = vpop.f32.mrf.mxu3  ;;  %1195 = vst [vmem:[%s2520_s9 + $0x70] sm:$0xff] %v1135_v45 }
 0x156   : > { %v1162_v46 = vadd.f32 %v1161_v0, %v2513_v3  ;;  %1185 = vst [vmem:[%s2520_s9 + $0x20] sm:$0xff] %v1075_v44 }
 0x158   : > { %1188 = vst [vmem:[%s2520_s9 + $0x38] sm:$0xff] %v1162_v46 }
 0x15a   : > { %v1137_v18 = vpop.f32.mrf.mxu2 }
 0x15b   : > { %v1076_v9 = vpop.f32.mrf.mxu0  ;;  %v1138_v54 = vadd.f32 %v1137_v18, %v2530_v11 }
 0x15c   : > { %v1077_v31 = vadd.f32 %v1076_v9, %v2525_v23 }
 0x15d   : > { %v1163_v12 = vpop.f32.mrf.mxu3  ;;  %1203 = vst [vmem:[%s2520_s9 + $0xb0] sm:$0xff] %v1138_v54 }
 0x15e   : > { %v1164_v10 = vadd.f32 %v1163_v12, %v2525_v23  ;;  %1193 = vst [vmem:[%s2520_s9 + $0x60] sm:$0xff] %v1077_v31 }
 0x160   : > { %1196 = vst [vmem:[%s2520_s9 + $0x78] sm:$0xff] %v1164_v10 }
 0x161   : > { %v1103_v2 = vpop.f32.mrf.mxu1 }
 0x162   : > { %v1104_v53 = vadd.f32 %v1103_v2, %v2513_v3  ;;  %v1139_v7 = vpop.f32.mrf.mxu2 }
 0x163   : > { %v1079_v6 = vpop.f32.mrf.mxu0  ;;  %v1140_v30 = vadd.f32 %v1139_v7, %v2543_v40 }
 0x164   : > { %1186 = vst [vmem:[%s2520_s9 + $0x28] sm:$0xff] %v1104_v53  ;;  %v1080_v61 = vadd.f32 %v1079_v6, %v2530_v11 }
 0x165   : > { %v1166_v62 = vpop.f32.mrf.mxu3  ;;  %1211 = vst [vmem:[%s2520_s9 + $0xf0] sm:$0xff] %v1140_v30 }
 0x166   : > { %v1167_v52 = vadd.f32 %v1166_v62, %v2530_v11  ;;  %1201 = vst [vmem:[%s2520_s9 + $0xa0] sm:$0xff] %v1080_v61 }
 0x168   : > { %1204 = vst [vmem:[%s2520_s9 + $0xb8] sm:$0xff] %v1167_v52 }
 0x169   : > { %v1105_v43 = vpop.f32.mrf.mxu1 }
 0x16a   : > { %v1106_v3 = vadd.f32 %v1105_v43, %v2525_v23  ;;  %v1142_v14 = vpop.f32.mrf.mxu2 }
 0x16b   : > { %v1081_v57 = vpop.f32.mrf.mxu0  ;;  %v1143_v35 = vadd.f32 %v1142_v14, %v2553_v41 }
 0x16c   : > { %1194 = vst [vmem:[%s2520_s9 + $0x68] sm:$0xff] %v1106_v3  ;;  %v1082_v34 = vadd.f32 %v1081_v57, %v2543_v40 }
 0x16d   : > { %v1168_v48 = vpop.f32.mrf.mxu3  ;;  %1219 = vst [vmem:[%s2520_s9 + $0x130] sm:$0xff] %v1143_v35 }
 0x16e   : > { %v1169_v42 = vadd.f32 %v1168_v48, %v2543_v40  ;;  %1209 = vst [vmem:[%s2520_s9 + $0xe0] sm:$0xff] %v1082_v34 }
 0x170   : > { %1212 = vst [vmem:[%s2520_s9 + $0xf8] sm:$0xff] %v1169_v42 }
 0x171   : > { %v1108_v4 = vpop.f32.mrf.mxu1 }
 0x172   : > { %v1109_v23 = vadd.f32 %v1108_v4, %v2530_v11  ;;  %v1144_v29 = vpop.f32.mrf.mxu2 }
 0x173   : > { %v1084_v36 = vpop.f32.mrf.mxu0  ;;  %v1145_v59 = vadd.f32 %v1144_v29, %v2563_v17 }
 0x174   : > { %1202 = vst [vmem:[%s2520_s9 + $0xa8] sm:$0xff] %v1109_v23  ;;  %v1085_v27 = vadd.f32 %v1084_v36, %v2553_v41 }
 0x175   : > { %v1171_v51 = vpop.f32.mrf.mxu3  ;;  %1227 = vst [vmem:[%s2520_s9 + $0x170] sm:$0xff] %v1145_v59 }
 0x176   : > { %v1172_v1 = vadd.f32 %v1171_v51, %v2553_v41  ;;  %1217 = vst [vmem:[%s2520_s9 + $0x120] sm:$0xff] %v1085_v27 }
 0x178   : > { %1220 = vst [vmem:[%s2520_s9 + $0x138] sm:$0xff] %v1172_v1 }
 0x179   : > { %v1110_v60 = vpop.f32.mrf.mxu1 }
 0x17a   : > { %v1111_v11 = vadd.f32 %v1110_v60, %v2543_v40  ;;  %v1147_v8 = vpop.f32.mrf.mxu2 }
 0x17b   : > { %v1086_v58 = vpop.f32.mrf.mxu0  ;;  %v1148_v33 = vadd.f32 %v1147_v8, %v2577_v15 }
 0x17c   : > { %1210 = vst [vmem:[%s2520_s9 + $0xe8] sm:$0xff] %v1111_v11  ;;  %v1087_v20 = vadd.f32 %v1086_v58, %v2563_v17 }
 0x17d   : > { %v1173_v5 = vpop.f32.mrf.mxu3  ;;  %1235 = vst [vmem:[%s2520_s9 + $0x1b0] sm:$0xff] %v1148_v33 }
 0x17e   : > { %v1174_v47 = vadd.f32 %v1173_v5, %v2563_v17  ;;  %1225 = vst [vmem:[%s2520_s9 + $0x160] sm:$0xff] %v1087_v20 }
 0x180   : > { %1228 = vst [vmem:[%s2520_s9 + $0x178] sm:$0xff] %v1174_v47 }
 0x181   : > { %v1113_v55 = vpop.f32.mrf.mxu1 }
 0x182   : > { %v1114_v40 = vadd.f32 %v1113_v55, %v2553_v41  ;;  %v1149_v28 = vpop.f32.mrf.mxu2 }
 0x183   : > { %v1089_v19 = vpop.f32.mrf.mxu0  ;;  %v1150_v37 = vadd.f32 %v1149_v28, %v2581_v21 }
 0x184   : > { %1218 = vst [vmem:[%s2520_s9 + $0x128] sm:$0xff] %v1114_v40  ;;  %v1090_v13 = vadd.f32 %v1089_v19, %v2577_v15 }
 0x185   : > { %v1176_v39 = vpop.f32.mrf.mxu3  ;;  %1243 = vst [vmem:[%s2520_s9 + $0x1f0] sm:$0xff] %v1150_v37 }
 0x186   : > { %v1177_v32 = vadd.f32 %v1176_v39, %v2577_v15  ;;  %1233 = vst [vmem:[%s2520_s9 + $0x1a0] sm:$0xff] %v1090_v13 }
 0x188   : > { %1236 = vst [vmem:[%s2520_s9 + $0x1b8] sm:$0xff] %v1177_v32 }
 0x189   : > { %v1115_v56 = vpop.f32.mrf.mxu1 }
 0x18a   : > { %v1116_v41 = vadd.f32 %v1115_v56, %v2563_v17 }
 0x18b   : > { %v1091_v16 = vpop.f32.mrf.mxu0 }
 0x18c   : > { %1226 = vst [vmem:[%s2520_s9 + $0x168] sm:$0xff] %v1116_v41  ;;  %v1092_v24 = vadd.f32 %v1091_v16, %v2581_v21 }
 0x18d   : > { %v1178_v49 = vpop.f32.mrf.mxu3 }
 0x18e   : > { %v1179_v26 = vadd.f32 %v1178_v49, %v2581_v21  ;;  %1241 = vst [vmem:[%s2520_s9 + $0x1e0] sm:$0xff] %v1092_v24 }
 0x190   : > { %1244 = vst [vmem:[%s2520_s9 + $0x1f8] sm:$0xff] %v1179_v26 }
 0x191   : > { %v1118_v22 = vpop.f32.mrf.mxu1 }
 0x192   : > { %v1119_v38 = vadd.f32 %v1118_v22, %v2577_v15 }
 0x194   : > { %1234 = vst [vmem:[%s2520_s9 + $0x1a8] sm:$0xff] %v1119_v38 }
 0x199   : > { %v1120_v17 = vpop.f32.mrf.mxu1 }
 0x19a   : > { %v1121_v25 = vadd.f32 %v1120_v17, %v2581_v21 }
 0x19c   : > { %1242 = vst [vmem:[%s2520_s9 + $0x1e8] sm:$0xff] %v1121_v25 }
 0x19d   : > { %1578 = shalt.err (!%p1575_p13)
}
 0x19e   : > { %s1638_s19 = smov 1024   ;;  %s1639_s7 = smov 64  }
 0x19f   : > { %1421 = dma.vmem_to_hbm [thread:$0]  (%p1711_p9), %s1261_s23, 8192, %s1263_s22, %s1246_s24, %s1638_s19, %s1638_s19, %s1639_s7  }
 0x1a0 PF: > { %s1277_s8 = sand.u32 1, %s1613_s12   ;;  %p1428_p0 = pnand %p1353_p12, %p1718_p11 }
 0x1a1   : > { %s1278_s9 = scalar_lea.sflag [#allocation4], %s1277_s8 }
 0x1a2   : > { %p1429_p1 = pneg %p1428_p0 }
 0x1a4   : > { %1608 = dma.done.wait (%p1429_p1), %s1278_s9, 8192  }
 0x1a5   : > { %1610 = vsyncadd (%p1429_p1), %s1278_s9, 4294959104  ;;  %s19_s17 = sadd.s32 1, %s1633_s17   ;;  %s2710_s12 = smov %s1617_s13 }
 0x1a6   : > { %p16_p2 = scmp.ge.s32.totalorder %s19_s17, 4   ;;  %s2711_s13 = smov %s1621_s14 }
 0x1a7   : > { %s2712_s14 = smov %s1716_s26  ;;  %s2713_s15 = smov %s1629_s16 }
 0x1a8   : > { %s2714_s16 = smov %s2716_s20  ;;  %18 = sbr.rel (!%p16_p2) target bundleno = 6 (0x6), region = 77 }
 0x1ad   :  { %1284 = vsyncpa [#allocation3], 1 }
 0x1ae   :  { %1286 = vsyncpa [#allocation3 + $0x1], 1 }
 0x1af   :  { %1287 = vsyncpa [#allocation4], 1 }
 0x1b0   :  { %1289 = vsyncpa [#allocation4 + $0x1], 1 }

</bundles_post_ra>
